<compile_context>
chip_gen: v7x
topology: tpu7x:2x2x1
jax: 0.10.0
libtpu: 0.0.40
codegen_flags: <defaults>
</compile_context>

<pallas_src>
import functools
import math

import jax
import jax.numpy as jnp
from jax.experimental import pallas as pl
from jax.experimental.pallas import tpu as pltpu


# ----------------------------- Pallas kernel --------------------------------


def _layer_norm(z, g, b, eps):
    """Torch-style LayerNorm over the last axis (biased variance), f32 math."""
    mu = jnp.mean(z, axis=-1, keepdims=True)
    d = z - mu
    var = jnp.mean(d * d, axis=-1, keepdims=True)
    return d * jax.lax.rsqrt(var + eps) * g + b


def _encoder_kernel(*refs, n_heads, seq_len, scale, eps, mxu_dtype, emit_attn):
    """Grid = (batch, layer).  One full encoder layer per step; the activation
    lives in a VMEM scratch across the layer axis ("arbitrary")."""
    xres = refs[-1]                                   # VMEM scratch (L, D) f32
    if emit_attn:
        o_ref, a_ref = refs[-3], refs[-2]
        in_refs = refs[:-3]
    else:
        o_ref, a_ref = refs[-2], None
        in_refs = refs[:-2]
    (x_ref, wq_ref, bq_ref, wk_ref, bk_ref, wv_ref, bv_ref,
     wo_ref, bo_ref, g1_ref, b1_ref,
     wff1_ref, bff1_ref, wff2_ref, bff2_ref, g2_ref, b2_ref,
     gf_ref, bf_ref) = in_refs

    layer = pl.program_id(1)
    n_layers = pl.num_programs(1)
    L = seq_len

    # Load the input activation once per batch block (layer == 0 only).
    @pl.when(layer == 0)
    def _():
        xres[...] = x_ref[0].astype(jnp.float32)

    x = xres[...]                                     # (L, D) f32, VMEM-resident
    xm = x.astype(mxu_dtype)

    # ----- multi-head self-attention -----------------------------------------
    # Per-head weights (pre-permuted outside jit) -> no lane-axis slicing of
    # activations and no concatenate; head merge is folded into the
    # out-projection accumulation:  attn_out = sum_h ctx_h @ Wo[h].
    # TODO(synk): attn_mask / tau / delta are None for this encoder config;
    #             masking is not applied.
    attn_out = jnp.zeros_like(x)
    for h in range(n_heads):
        qh = jnp.dot(xm, wq_ref[0, h].astype(mxu_dtype),
                     preferred_element_type=jnp.float32) + bq_ref[0, h]
        kh = jnp.dot(xm, wk_ref[0, h].astype(mxu_dtype),
                     preferred_element_type=jnp.float32) + bk_ref[0, h]
        vh = jnp.dot(xm, wv_ref[0, h].astype(mxu_dtype),
                     preferred_element_type=jnp.float32) + bv_ref[0, h]

        s = jnp.dot(qh.astype(mxu_dtype), kh.astype(mxu_dtype).T,
                    preferred_element_type=jnp.float32) * scale        # (L, L)
        s = s - jnp.max(s, axis=-1, keepdims=True)
        e = jnp.exp(s)
        p = e * pl.reciprocal(jnp.sum(e, axis=-1, keepdims=True), approx=True)

        if emit_attn:
            # Assemble all heads into one lane-dense (L, H*L) tile; Pallas
            # flushes the whole block to HBM once per (layer, batch) step.
            a_ref[0, 0, :, h * L:(h + 1) * L] = p.astype(a_ref.dtype)

        ctx = jnp.dot(p.astype(mxu_dtype), vh.astype(mxu_dtype),
                      preferred_element_type=jnp.float32)              # (L, E)
        attn_out = attn_out + jnp.dot(ctx.astype(mxu_dtype),
                                      wo_ref[0, h].astype(mxu_dtype),
                                      preferred_element_type=jnp.float32)
    attn_out = attn_out + bo_ref[0]

    # ----- residual + LayerNorm1 ----------------------------------------------
    x1 = _layer_norm(x + attn_out, g1_ref[0], b1_ref[0], eps)

    # ----- FFN: 1x1 conv -> ReLU -> 1x1 conv == dense -> relu -> dense --------
    y = jnp.dot(x1.astype(mxu_dtype), wff1_ref[0].astype(mxu_dtype),
                preferred_element_type=jnp.float32) + bff1_ref[0]
    y = jnp.maximum(y, 0.0)
    y = jnp.dot(y.astype(mxu_dtype), wff2_ref[0].astype(mxu_dtype),
                preferred_element_type=jnp.float32) + bff2_ref[0]

    # ----- residual + LayerNorm2, keep resident for next layer ----------------
    x2 = _layer_norm(x1 + y, g2_ref[0], b2_ref[0], eps)
    xres[...] = x2

    # ----- final encoder LayerNorm fused into the last layer step -------------
    @pl.when(layer == n_layers - 1)
    def _():
        o_ref[0] = _layer_norm(x2, gf_ref[...], bf_ref[...], eps).astype(o_ref.dtype)


# ------------------------------- wrappers ------------------------------------


def prepare_params(layer_params, norm_params, n_heads):
    """One-time parameter repack (call OUTSIDE jit): stack layers on a leading
    axis and pre-permute attention weights into per-head layouts."""
    nl = len(layer_params)
    d_model = layer_params[0]["wq"].shape[0]
    d_ff = layer_params[0]["w_ff1"].shape[1]
    e = d_model // n_heads

    def stack(name):
        return jnp.stack([p[name] for p in layer_params])

    def per_head_in(name):            # (NL, D, D) -> (NL, H, D, E)
        return stack(name).reshape(nl, d_model, n_heads, e).transpose(0, 2, 1, 3)

    packed = dict(
        wq=per_head_in("wq"), wk=per_head_in("wk"), wv=per_head_in("wv"),
        bq=stack("bq").reshape(nl, n_heads, 1, e),
        bk=stack("bk").reshape(nl, n_heads, 1, e),
        bv=stack("bv").reshape(nl, n_heads, 1, e),
        wo=stack("wo").reshape(nl, n_heads, e, d_model),      # rows grouped per head
        bo=stack("bo").reshape(nl, 1, d_model),
        g1=stack("g1").reshape(nl, 1, d_model),
        b1=stack("b1").reshape(nl, 1, d_model),
        w_ff1=stack("w_ff1"),
        b_ff1=stack("b_ff1").reshape(nl, 1, d_ff),
        w_ff2=stack("w_ff2"),
        b_ff2=stack("b_ff2").reshape(nl, 1, d_model),
        g2=stack("g2").reshape(nl, 1, d_model),
        b2=stack("b2").reshape(nl, 1, d_model),
        gf=norm_params["g"].reshape(1, d_model),
        bf=norm_params["b"].reshape(1, d_model),
    )
    return packed


def msptst_encoder(x, packed, n_heads, output_attention=True, eps=1e-5,
                   mxu_dtype=jnp.float32):
    """MSPTSTEncoder.forward: x [B, L, D] -> (x_out [B, L, D], attns list).

    Single fused pallas_call over grid=(B, n_layers); activations stay in VMEM
    across layers.  Set mxu_dtype=jnp.bfloat16 for production-size D/DFF.
    """
    B, L, D = x.shape
    NL = packed["wq"].shape[0]
    H = n_heads
    E = D // H
    DFF = packed["w_ff1"].shape[2]
    scale = 1.0 / math.sqrt(E)

    def layer_spec(shape):
        # Per-layer weight block: leading layer axis indexed by the grid's
        # layer dimension.  Default double-buffering prefetches the next
        # layer's weights under the current layer's compute.
        nd = len(shape)
        return pl.BlockSpec((1,) + shape,
                            lambda b, l, _nd=nd: (l,) + (0,) * _nd)

    in_specs = [
        pl.BlockSpec((1, L, D), lambda b, l: (b, 0, 0)),       # activations
        layer_spec((H, D, E)), layer_spec((H, 1, E)),          # Wq / bq (per head)
        layer_spec((H, D, E)), layer_spec((H, 1, E)),          # Wk / bk
        layer_spec((H, D, E)), layer_spec((H, 1, E)),          # Wv / bv
        layer_spec((H, E, D)), layer_spec((1, D)),             # Wo / bo
        layer_spec((1, D)), layer_spec((1, D)),                # norm1 gamma/beta
        layer_spec((D, DFF)), layer_spec((1, DFF)),            # ffn1
        layer_spec((DFF, D)), layer_spec((1, D)),              # ffn2
        layer_spec((1, D)), layer_spec((1, D)),                # norm2 gamma/beta
        pl.BlockSpec((1, D), lambda b, l: (0, 0)),             # final norm gamma
        pl.BlockSpec((1, D), lambda b, l: (0, 0)),             # final norm beta
    ]

    out_shapes = [jax.ShapeDtypeStruct((B, L, D), x.dtype)]
    out_specs = [pl.BlockSpec((1, L, D), lambda b, l: (b, 0, 0))]
    if output_attention:
        # Lane-dense packed attention: [NL, B, L, H*L]; reshaped below.
        out_shapes.append(jax.ShapeDtypeStruct((NL, B, L, H * L), jnp.float32))
        out_specs.append(pl.BlockSpec((1, 1, L, H * L), lambda b, l: (l, b, 0, 0)))

    kernel = functools.partial(
        _encoder_kernel, n_heads=H, seq_len=L, scale=scale, eps=eps,
        mxu_dtype=mxu_dtype, emit_attn=output_attention)

    results = pl.pallas_call(
        kernel,
        out_shape=tuple(out_shapes),
        grid=(B, NL),
        in_specs=in_specs,
        out_specs=tuple(out_specs),
        scratch_shapes=[pltpu.VMEM((L, D), jnp.float32)],      # resident activation
        compiler_params=pltpu.CompilerParams(
            dimension_semantics=("parallel", "arbitrary"),
            vmem_limit_bytes=32 * 1024 * 1024),
    )(x,
      packed["wq"], packed["bq"], packed["wk"], packed["bk"],
      packed["wv"], packed["bv"], packed["wo"], packed["bo"],
      packed["g1"], packed["b1"],
      packed["w_ff1"], packed["b_ff1"], packed["w_ff2"], packed["b_ff2"],
      packed["g2"], packed["b2"],
      packed["gf"], packed["bf"])

    if output_attention:
        x_out, attn_flat = results
        attns = [attn_flat[i].reshape(B, L, H, L).transpose(0, 2, 1, 3)
                 for i in range(NL)]
    else:
        (x_out,) = results
        attns = [None] * NL
    return x_out, attns


# -------------------------- pure-JAX reference -------------------------------


def _ref_ln(z, g, b, eps=1e-5):
    mu = jnp.mean(z, axis=-1, keepdims=True)
    var = jnp.mean((z - mu) ** 2, axis=-1, keepdims=True)
    return (z - mu) * jax.lax.rsqrt(var + eps) * g + b


def ref_forward(x, layer_params, norm_params, n_heads):
    attns = []
    for p in layer_params:
        B, L, D = x.shape
        E = D // n_heads
        xf = x.reshape(B * L, D)
        q = (xf @ p["wq"] + p["bq"]).reshape(B, L, n_heads, E).transpose(0, 2, 1, 3)
        k = (xf @ p["wk"] + p["bk"]).reshape(B, L, n_heads, E).transpose(0, 2, 1, 3)
        v = (xf @ p["wv"] + p["bv"]).reshape(B, L, n_heads, E).transpose(0, 2, 1, 3)
        s = jnp.einsum("bhle,bhse->bhls", q, k) / math.sqrt(E)
        a = jax.nn.softmax(s, axis=-1)
        o = jnp.einsum("bhls,bhse->bhle", a, v)
        o = o.transpose(0, 2, 1, 3).reshape(B * L, D) @ p["wo"] + p["bo"]
        x1 = _ref_ln(xf + o, p["g1"], p["b1"])
        y = jnp.maximum(x1 @ p["w_ff1"] + p["b_ff1"], 0.0)
        y = y @ p["w_ff2"] + p["b_ff2"]
        x = _ref_ln(x1 + y, p["g2"], p["b2"]).reshape(B, L, D)
        attns.append(a)
    x = _ref_ln(x, norm_params["g"], norm_params["b"])
    return x, attns


# --------------------------------- main ---------------------------------------


def make_params(key, d_model, d_ff, n_layers):
    layer_params = []
    for _ in range(n_layers):
        keys = jax.random.split(key, 7)
        key = keys[0]
        s = 0.05
        layer_params.append(dict(
            wq=s * jax.random.normal(keys[1], (d_model, d_model), jnp.float32),
            bq=jnp.zeros((d_model,), jnp.float32),
            wk=s * jax.random.normal(keys[2], (d_model, d_model), jnp.float32),
            bk=jnp.zeros((d_model,), jnp.float32),
            wv=s * jax.random.normal(keys[3], (d_model, d_model), jnp.float32),
            bv=jnp.zeros((d_model,), jnp.float32),
            wo=s * jax.random.normal(keys[4], (d_model, d_model), jnp.float32),
            bo=jnp.zeros((d_model,), jnp.float32),
            w_ff1=s * jax.random.normal(keys[5], (d_model, d_ff), jnp.float32),
            b_ff1=jnp.zeros((d_ff,), jnp.float32),
            w_ff2=s * jax.random.normal(keys[6], (d_ff, d_model), jnp.float32),
            b_ff2=jnp.zeros((d_model,), jnp.float32),
            g1=jnp.ones((d_model,), jnp.float32),
            b1=jnp.zeros((d_model,), jnp.float32),
            g2=jnp.ones((d_model,), jnp.float32),
            b2=jnp.zeros((d_model,), jnp.float32),
        ))
    norm_params = dict(g=jnp.ones((d_model,), jnp.float32),
                       b=jnp.zeros((d_model,), jnp.float32))
    return layer_params, norm_params


if __name__ == "__main__":
    B, L, D, H, DFF, NLAYERS = 2, 8, 32, 4, 64, 2

    key = jax.random.PRNGKey(0)
    kx, kp = jax.random.split(key)
    x = jax.random.normal(kx, (B, L, D), jnp.float32)   # [batch, patches, d_model]
    layer_params, norm_params = make_params(kp, D, DFF, NLAYERS)

    # One-time parameter repack, outside jit (stack layers + per-head permute).
    packed = prepare_params(layer_params, norm_params, H)

    forward = jax.jit(functools.partial(msptst_encoder, n_heads=H,
                                        output_attention=True))
    out, attns = forward(x, packed)
    out = jax.block_until_ready(out)
    attns = [jax.block_until_ready(a) for a in attns]

    # cross-check against a pure-JAX reference of the same math
    ref_out, ref_attns = ref_forward(x, layer_params, norm_params, H)
    assert out.shape == (B, L, D)
    assert all(a.shape == (B, H, L, L) for a in attns)
    assert jnp.allclose(out, ref_out, rtol=1e-3, atol=1e-3)
    for a, ra in zip(attns, ref_attns):
        assert jnp.allclose(a, ra, rtol=1e-3, atol=1e-3)

    # production fast path: skip the attention-matrix write entirely
    forward_na = jax.jit(functools.partial(msptst_encoder, n_heads=H,
                                           output_attention=False))
    out_na, _ = forward_na(x, packed)
    out_na = jax.block_until_ready(out_na)
    assert jnp.allclose(out_na, ref_out, rtol=1e-3, atol=1e-3)

    print("KERNEL_OK")
</pallas_src>

<mosaic_0001>
module attributes {stable_mosaic.version = 11 : i64} {
  func.func @_encoder_kernel(%arg0: i32, %arg1: i32, %arg2: memref<1x8x32xf32, #tpu.memory_space<vmem>>, %arg3: memref<1x4x32x8xf32, #tpu.memory_space<vmem>>, %arg4: memref<1x4x1x8xf32, #tpu.memory_space<vmem>>, %arg5: memref<1x4x32x8xf32, #tpu.memory_space<vmem>>, %arg6: memref<1x4x1x8xf32, #tpu.memory_space<vmem>>, %arg7: memref<1x4x32x8xf32, #tpu.memory_space<vmem>>, %arg8: memref<1x4x1x8xf32, #tpu.memory_space<vmem>>, %arg9: memref<1x4x8x32xf32, #tpu.memory_space<vmem>>, %arg10: memref<1x1x32xf32, #tpu.memory_space<vmem>>, %arg11: memref<1x1x32xf32, #tpu.memory_space<vmem>>, %arg12: memref<1x1x32xf32, #tpu.memory_space<vmem>>, %arg13: memref<1x32x64xf32, #tpu.memory_space<vmem>>, %arg14: memref<1x1x64xf32, #tpu.memory_space<vmem>>, %arg15: memref<1x64x32xf32, #tpu.memory_space<vmem>>, %arg16: memref<1x1x32xf32, #tpu.memory_space<vmem>>, %arg17: memref<1x1x32xf32, #tpu.memory_space<vmem>>, %arg18: memref<1x1x32xf32, #tpu.memory_space<vmem>>, %arg19: memref<1x32xf32, #tpu.memory_space<vmem>>, %arg20: memref<1x32xf32, #tpu.memory_space<vmem>>, %arg21: memref<1x8x32xf32, #tpu.memory_space<vmem>>, %arg22: memref<1x1x8x32xf32, #tpu.memory_space<vmem>>, %arg23: memref<8x32xf32, #tpu.memory_space<vmem>>) attributes {dimension_semantics = [#tpu.dimension_semantics<parallel>, #tpu.dimension_semantics<arbitrary>], iteration_bounds = array<i64: 2, 2>, scalar_prefetch = 0 : i64, scratch_operands = 1 : i64, tpu.core_type = #tpu.core_type<tc>, window_params = [{transform_indices = @transform_0, window_bounds = array<i64: 1, 8, 32>}, {transform_indices = @transform_1, window_bounds = array<i64: 1, 4, 32, 8>}, {transform_indices = @transform_2, window_bounds = array<i64: 1, 4, 1, 8>}, {transform_indices = @transform_3, window_bounds = array<i64: 1, 4, 32, 8>}, {transform_indices = @transform_4, window_bounds = array<i64: 1, 4, 1, 8>}, {transform_indices = @transform_5, window_bounds = array<i64: 1, 4, 32, 8>}, {transform_indices = @transform_6, window_bounds = array<i64: 1, 4, 1, 8>}, {transform_indices = @transform_7, window_bounds = array<i64: 1, 4, 8, 32>}, {transform_indices = @transform_8, window_bounds = array<i64: 1, 1, 32>}, {transform_indices = @transform_9, window_bounds = array<i64: 1, 1, 32>}, {transform_indices = @transform_10, window_bounds = array<i64: 1, 1, 32>}, {transform_indices = @transform_11, window_bounds = array<i64: 1, 32, 64>}, {transform_indices = @transform_12, window_bounds = array<i64: 1, 1, 64>}, {transform_indices = @transform_13, window_bounds = array<i64: 1, 64, 32>}, {transform_indices = @transform_14, window_bounds = array<i64: 1, 1, 32>}, {transform_indices = @transform_15, window_bounds = array<i64: 1, 1, 32>}, {transform_indices = @transform_16, window_bounds = array<i64: 1, 1, 32>}, {pipeline_mode = #tpu.pipeline_mode<synchronous>, transform_indices = @transform_17, window_bounds = array<i64: 1, 32>}, {pipeline_mode = #tpu.pipeline_mode<synchronous>, transform_indices = @transform_18, window_bounds = array<i64: 1, 32>}, {transform_indices = @transform_19, window_bounds = array<i64: 1, 8, 32>}, {transform_indices = @transform_20, window_bounds = array<i64: 1, 1, 8, 32>}]} {
    %c0_i32 = arith.constant 0 : i32
    %0 = arith.cmpi eq, %arg1, %c0_i32 : i32
    %1 = arith.extui %0 : i1 to i32
    %c0_i32_0 = arith.constant 0 : i32
    %2 = arith.cmpi ne, %1, %c0_i32_0 : i32
    scf.if %2 {
      %c0_203 = arith.constant 0 : index
      %c0_204 = arith.constant 0 : index
      %c0_205 = arith.constant 0 : index
      %251 = vector.load %arg2[%c0_203, %c0_204, %c0_205] : memref<1x8x32xf32, #tpu.memory_space<vmem>>, vector<1x8x32xf32>
      %252 = vector.shape_cast %251 : vector<1x8x32xf32> to vector<8x32xf32>
      %c0_206 = arith.constant 0 : index
      %c0_207 = arith.constant 0 : index
      %253 = vector.load %arg23[%c0_206, %c0_207] : memref<8x32xf32, #tpu.memory_space<vmem>>, vector<8x32xf32>
      tpu.vector_store %arg23[%c0_206, %c0_207], %252 {strides = array<i32>} : memref<8x32xf32, #tpu.memory_space<vmem>>, vector<8x32xf32>,
    } else {
    }
    %c0 = arith.constant 0 : index
    %c0_1 = arith.constant 0 : index
    %3 = vector.load %arg23[%c0, %c0_1] : memref<8x32xf32, #tpu.memory_space<vmem>>, vector<8x32xf32>
    %cst = arith.constant 0.000000e+00 : f32
    %4 = vector.broadcast %cst : f32 to vector<8x32xf32>
    %c0_2 = arith.constant 0 : index
    %c0_3 = arith.constant 0 : index
    %c0_4 = arith.constant 0 : index
    %c0_5 = arith.constant 0 : index
    %5 = vector.load %arg3[%c0_2, %c0_3, %c0_4, %c0_5] : memref<1x4x32x8xf32, #tpu.memory_space<vmem>>, vector<1x1x32x8xf32>
    %6 = vector.shape_cast %5 : vector<1x1x32x8xf32> to vector<32x8xf32>
    %cst_6 = arith.constant dense<0.000000e+00> : vector<8x8xf32>
    %7 = tpu.matmul %3, %6, %cst_6 {dimension_numbers = #tpu.dot_dimension_numbers<[1], [0], [0], [1], [0, 0, 1, 1], [], []>} : vector<8x32xf32>, vector<32x8xf32>, vector<8x8xf32> -> vector<8x8xf32>
    %c0_7 = arith.constant 0 : index
    %c0_8 = arith.constant 0 : index
    %c0_9 = arith.constant 0 : index
    %c0_10 = arith.constant 0 : index
    %8 = vector.load %arg4[%c0_7, %c0_8, %c0_9, %c0_10] : memref<1x4x1x8xf32, #tpu.memory_space<vmem>>, vector<1x1x1x8xf32>
    %9 = vector.shape_cast %8 : vector<1x1x1x8xf32> to vector<1x8xf32>
    %10 = vector.broadcast %9 : vector<1x8xf32> to vector<8x8xf32>
    %11 = arith.addf %7, %10 : vector<8x8xf32>
    %c0_11 = arith.constant 0 : index
    %c0_12 = arith.constant 0 : index
    %c0_13 = arith.constant 0 : index
    %c0_14 = arith.constant 0 : index
    %12 = vector.load %arg5[%c0_11, %c0_12, %c0_13, %c0_14] : memref<1x4x32x8xf32, #tpu.memory_space<vmem>>, vector<1x1x32x8xf32>
    %13 = vector.shape_cast %12 : vector<1x1x32x8xf32> to vector<32x8xf32>
    %cst_15 = arith.constant dense<0.000000e+00> : vector<8x8xf32>
    %14 = tpu.matmul %3, %13, %cst_15 {dimension_numbers = #tpu.dot_dimension_numbers<[1], [0], [0], [1], [0, 0, 1, 1], [], []>} : vector<8x32xf32>, vector<32x8xf32>, vector<8x8xf32> -> vector<8x8xf32>
    %c0_16 = arith.constant 0 : index
    %c0_17 = arith.constant 0 : index
    %c0_18 = arith.constant 0 : index
    %c0_19 = arith.constant 0 : index
    %15 = vector.load %arg6[%c0_16, %c0_17, %c0_18, %c0_19] : memref<1x4x1x8xf32, #tpu.memory_space<vmem>>, vector<1x1x1x8xf32>
    %16 = vector.shape_cast %15 : vector<1x1x1x8xf32> to vector<1x8xf32>
    %17 = vector.broadcast %16 : vector<1x8xf32> to vector<8x8xf32>
    %18 = arith.addf %14, %17 : vector<8x8xf32>
    %c0_20 = arith.constant 0 : index
    %c0_21 = arith.constant 0 : index
    %c0_22 = arith.constant 0 : index
    %c0_23 = arith.constant 0 : index
    %19 = vector.load %arg7[%c0_20, %c0_21, %c0_22, %c0_23] : memref<1x4x32x8xf32, #tpu.memory_space<vmem>>, vector<1x1x32x8xf32>
    %20 = vector.shape_cast %19 : vector<1x1x32x8xf32> to vector<32x8xf32>
    %cst_24 = arith.constant dense<0.000000e+00> : vector<8x8xf32>
    %21 = tpu.matmul %3, %20, %cst_24 {dimension_numbers = #tpu.dot_dimension_numbers<[1], [0], [0], [1], [0, 0, 1, 1], [], []>} : vector<8x32xf32>, vector<32x8xf32>, vector<8x8xf32> -> vector<8x8xf32>
    %c0_25 = arith.constant 0 : index
    %c0_26 = arith.constant 0 : index
    %c0_27 = arith.constant 0 : index
    %c0_28 = arith.constant 0 : index
    %22 = vector.load %arg8[%c0_25, %c0_26, %c0_27, %c0_28] : memref<1x4x1x8xf32, #tpu.memory_space<vmem>>, vector<1x1x1x8xf32>
    %23 = vector.shape_cast %22 : vector<1x1x1x8xf32> to vector<1x8xf32>
    %24 = vector.broadcast %23 : vector<1x8xf32> to vector<8x8xf32>
    %25 = arith.addf %21, %24 : vector<8x8xf32>
    %26 = tpu.transpose %18, [1, 0] : vector<8x8xf32> -> vector<8x8xf32>
    %cst_29 = arith.constant dense<0.000000e+00> : vector<8x8xf32>
    %27 = tpu.matmul %11, %26, %cst_29 {dimension_numbers = #tpu.dot_dimension_numbers<[1], [0], [0], [1], [0, 0, 1, 1], [], []>} : vector<8x8xf32>, vector<8x8xf32>, vector<8x8xf32> -> vector<8x8xf32>
    %cst_30 = arith.constant 0.353553385 : f32
    %28 = vector.broadcast %cst_30 : f32 to vector<8x8xf32>
    %29 = arith.mulf %27, %28 : vector<8x8xf32>
    %cst_31 = arith.constant dense<0xFF800000> : vector<8xf32>
    %30 = vector.multi_reduction <maximumf>, %29, %cst_31 [1] : vector<8x8xf32> to vector<8xf32>
    %31 = vector.shape_cast %30 : vector<8xf32> to vector<8x1xf32>
    %32 = vector.broadcast %31 : vector<8x1xf32> to vector<8x8xf32>
    %33 = arith.subf %29, %32 : vector<8x8xf32>
    %34 = math.exp %33 : vector<8x8xf32>
    %cst_32 = arith.constant dense<0.000000e+00> : vector<8xf32>
    %35 = vector.multi_reduction <add>, %34, %cst_32 [1] : vector<8x8xf32> to vector<8xf32>
    %36 = vector.shape_cast %35 : vector<8xf32> to vector<8x1xf32>
    %37 = tpu.reciprocal %36 {approx = true} : vector<8x1xf32> -> vector<8x1xf32>
    %38 = vector.broadcast %37 : vector<8x1xf32> to vector<8x8xf32>
    %39 = arith.mulf %34, %38 : vector<8x8xf32>
    %c0_33 = arith.constant 0 : index
    %c0_34 = arith.constant 0 : index
    %c0_35 = arith.constant 0 : index
    %c0_36 = arith.constant 0 : index
    %40 = vector.load %arg22[%c0_33, %c0_34, %c0_35, %c0_36] : memref<1x1x8x32xf32, #tpu.memory_space<vmem>>, vector<1x1x8x8xf32>
    %41 = vector.shape_cast %40 : vector<1x1x8x8xf32> to vector<8x8xf32>
    %42 = vector.shape_cast %39 : vector<8x8xf32> to vector<1x1x8x8xf32>
    tpu.vector_store %arg22[%c0_33, %c0_34, %c0_35, %c0_36], %42 {strides = array<i32>} : memref<1x1x8x32xf32, #tpu.memory_space<vmem>>, vector<1x1x8x8xf32>,
    %cst_37 = arith.constant dense<0.000000e+00> : vector<8x8xf32>
    %43 = tpu.matmul %39, %25, %cst_37 {dimension_numbers = #tpu.dot_dimension_numbers<[1], [0], [0], [1], [0, 0, 1, 1], [], []>} : vector<8x8xf32>, vector<8x8xf32>, vector<8x8xf32> -> vector<8x8xf32>
    %c0_38 = arith.constant 0 : index
    %c0_39 = arith.constant 0 : index
    %c0_40 = arith.constant 0 : index
    %c0_41 = arith.constant 0 : index
    %44 = vector.load %arg9[%c0_38, %c0_39, %c0_40, %c0_41] : memref<1x4x8x32xf32, #tpu.memory_space<vmem>>, vector<1x1x8x32xf32>
    %45 = vector.shape_cast %44 : vector<1x1x8x32xf32> to vector<8x32xf32>
    %cst_42 = arith.constant dense<0.000000e+00> : vector<8x32xf32>
    %46 = tpu.matmul %43, %45, %cst_42 {dimension_numbers = #tpu.dot_dimension_numbers<[1], [0], [0], [1], [0, 0, 1, 1], [], []>} : vector<8x8xf32>, vector<8x32xf32>, vector<8x32xf32> -> vector<8x32xf32>
    %47 = arith.addf %4, %46 : vector<8x32xf32>
    %c0_43 = arith.constant 0 : index
    %c1 = arith.constant 1 : index
    %c0_44 = arith.constant 0 : index
    %c0_45 = arith.constant 0 : index
    %48 = vector.load %arg3[%c0_43, %c1, %c0_44, %c0_45] : memref<1x4x32x8xf32, #tpu.memory_space<vmem>>, vector<1x1x32x8xf32>
    %49 = vector.shape_cast %48 : vector<1x1x32x8xf32> to vector<32x8xf32>
    %cst_46 = arith.constant dense<0.000000e+00> : vector<8x8xf32>
    %50 = tpu.matmul %3, %49, %cst_46 {dimension_numbers = #tpu.dot_dimension_numbers<[1], [0], [0], [1], [0, 0, 1, 1], [], []>} : vector<8x32xf32>, vector<32x8xf32>, vector<8x8xf32> -> vector<8x8xf32>
    %c0_47 = arith.constant 0 : index
    %c1_48 = arith.constant 1 : index
    %c0_49 = arith.constant 0 : index
    %c0_50 = arith.constant 0 : index
    %51 = vector.load %arg4[%c0_47, %c1_48, %c0_49, %c0_50] : memref<1x4x1x8xf32, #tpu.memory_space<vmem>>, vector<1x1x1x8xf32>
    %52 = vector.shape_cast %51 : vector<1x1x1x8xf32> to vector<1x8xf32>
    %53 = vector.broadcast %52 : vector<1x8xf32> to vector<8x8xf32>
    %54 = arith.addf %50, %53 : vector<8x8xf32>
    %c0_51 = arith.constant 0 : index
    %c1_52 = arith.constant 1 : index
    %c0_53 = arith.constant 0 : index
    %c0_54 = arith.constant 0 : index
    %55 = vector.load %arg5[%c0_51, %c1_52, %c0_53, %c0_54] : memref<1x4x32x8xf32, #tpu.memory_space<vmem>>, vector<1x1x32x8xf32>
    %56 = vector.shape_cast %55 : vector<1x1x32x8xf32> to vector<32x8xf32>
    %cst_55 = arith.constant dense<0.000000e+00> : vector<8x8xf32>
    %57 = tpu.matmul %3, %56, %cst_55 {dimension_numbers = #tpu.dot_dimension_numbers<[1], [0], [0], [1], [0, 0, 1, 1], [], []>} : vector<8x32xf32>, vector<32x8xf32>, vector<8x8xf32> -> vector<8x8xf32>
    %c0_56 = arith.constant 0 : index
    %c1_57 = arith.constant 1 : index
    %c0_58 = arith.constant 0 : index
    %c0_59 = arith.constant 0 : index
    %58 = vector.load %arg6[%c0_56, %c1_57, %c0_58, %c0_59] : memref<1x4x1x8xf32, #tpu.memory_space<vmem>>, vector<1x1x1x8xf32>
    %59 = vector.shape_cast %58 : vector<1x1x1x8xf32> to vector<1x8xf32>
    %60 = vector.broadcast %59 : vector<1x8xf32> to vector<8x8xf32>
    %61 = arith.addf %57, %60 : vector<8x8xf32>
    %c0_60 = arith.constant 0 : index
    %c1_61 = arith.constant 1 : index
    %c0_62 = arith.constant 0 : index
    %c0_63 = arith.constant 0 : index
    %62 = vector.load %arg7[%c0_60, %c1_61, %c0_62, %c0_63] : memref<1x4x32x8xf32, #tpu.memory_space<vmem>>, vector<1x1x32x8xf32>
    %63 = vector.shape_cast %62 : vector<1x1x32x8xf32> to vector<32x8xf32>
    %cst_64 = arith.constant dense<0.000000e+00> : vector<8x8xf32>
    %64 = tpu.matmul %3, %63, %cst_64 {dimension_numbers = #tpu.dot_dimension_numbers<[1], [0], [0], [1], [0, 0, 1, 1], [], []>} : vector<8x32xf32>, vector<32x8xf32>, vector<8x8xf32> -> vector<8x8xf32>
    %c0_65 = arith.constant 0 : index
    %c1_66 = arith.constant 1 : index
    %c0_67 = arith.constant 0 : index
    %c0_68 = arith.constant 0 : index
    %65 = vector.load %arg8[%c0_65, %c1_66, %c0_67, %c0_68] : memref<1x4x1x8xf32, #tpu.memory_space<vmem>>, vector<1x1x1x8xf32>
    %66 = vector.shape_cast %65 : vector<1x1x1x8xf32> to vector<1x8xf32>
    %67 = vector.broadcast %66 : vector<1x8xf32> to vector<8x8xf32>
    %68 = arith.addf %64, %67 : vector<8x8xf32>
    %69 = tpu.transpose %61, [1, 0] : vector<8x8xf32> -> vector<8x8xf32>
    %cst_69 = arith.constant dense<0.000000e+00> : vector<8x8xf32>
    %70 = tpu.matmul %54, %69, %cst_69 {dimension_numbers = #tpu.dot_dimension_numbers<[1], [0], [0], [1], [0, 0, 1, 1], [], []>} : vector<8x8xf32>, vector<8x8xf32>, vector<8x8xf32> -> vector<8x8xf32>
    %cst_70 = arith.constant 0.353553385 : f32
    %71 = vector.broadcast %cst_70 : f32 to vector<8x8xf32>
    %72 = arith.mulf %70, %71 : vector<8x8xf32>
    %cst_71 = arith.constant dense<0xFF800000> : vector<8xf32>
    %73 = vector.multi_reduction <maximumf>, %72, %cst_71 [1] : vector<8x8xf32> to vector<8xf32>
    %74 = vector.shape_cast %73 : vector<8xf32> to vector<8x1xf32>
    %75 = vector.broadcast %74 : vector<8x1xf32> to vector<8x8xf32>
    %76 = arith.subf %72, %75 : vector<8x8xf32>
    %77 = math.exp %76 : vector<8x8xf32>
    %cst_72 = arith.constant dense<0.000000e+00> : vector<8xf32>
    %78 = vector.multi_reduction <add>, %77, %cst_72 [1] : vector<8x8xf32> to vector<8xf32>
    %79 = vector.shape_cast %78 : vector<8xf32> to vector<8x1xf32>
    %80 = tpu.reciprocal %79 {approx = true} : vector<8x1xf32> -> vector<8x1xf32>
    %81 = vector.broadcast %80 : vector<8x1xf32> to vector<8x8xf32>
    %82 = arith.mulf %77, %81 : vector<8x8xf32>
    %c0_73 = arith.constant 0 : index
    %c0_74 = arith.constant 0 : index
    %c0_75 = arith.constant 0 : index
    %c8 = arith.constant 8 : index
    %83 = vector.load %arg22[%c0_73, %c0_74, %c0_75, %c8] : memref<1x1x8x32xf32, #tpu.memory_space<vmem>>, vector<1x1x8x8xf32>
    %84 = vector.shape_cast %83 : vector<1x1x8x8xf32> to vector<8x8xf32>
    %85 = vector.shape_cast %82 : vector<8x8xf32> to vector<1x1x8x8xf32>
    tpu.vector_store %arg22[%c0_73, %c0_74, %c0_75, %c8], %85 {strides = array<i32>} : memref<1x1x8x32xf32, #tpu.memory_space<vmem>>, vector<1x1x8x8xf32>,
    %cst_76 = arith.constant dense<0.000000e+00> : vector<8x8xf32>
    %86 = tpu.matmul %82, %68, %cst_76 {dimension_numbers = #tpu.dot_dimension_numbers<[1], [0], [0], [1], [0, 0, 1, 1], [], []>} : vector<8x8xf32>, vector<8x8xf32>, vector<8x8xf32> -> vector<8x8xf32>
    %c0_77 = arith.constant 0 : index
    %c1_78 = arith.constant 1 : index
    %c0_79 = arith.constant 0 : index
    %c0_80 = arith.constant 0 : index
    %87 = vector.load %arg9[%c0_77, %c1_78, %c0_79, %c0_80] : memref<1x4x8x32xf32, #tpu.memory_space<vmem>>, vector<1x1x8x32xf32>
    %88 = vector.shape_cast %87 : vector<1x1x8x32xf32> to vector<8x32xf32>
    %cst_81 = arith.constant dense<0.000000e+00> : vector<8x32xf32>
    %89 = tpu.matmul %86, %88, %cst_81 {dimension_numbers = #tpu.dot_dimension_numbers<[1], [0], [0], [1], [0, 0, 1, 1], [], []>} : vector<8x8xf32>, vector<8x32xf32>, vector<8x32xf32> -> vector<8x32xf32>
    %90 = arith.addf %47, %89 : vector<8x32xf32>
    %c0_82 = arith.constant 0 : index
    %c2 = arith.constant 2 : index
    %c0_83 = arith.constant 0 : index
    %c0_84 = arith.constant 0 : index
    %91 = vector.load %arg3[%c0_82, %c2, %c0_83, %c0_84] : memref<1x4x32x8xf32, #tpu.memory_space<vmem>>, vector<1x1x32x8xf32>
    %92 = vector.shape_cast %91 : vector<1x1x32x8xf32> to vector<32x8xf32>
    %cst_85 = arith.constant dense<0.000000e+00> : vector<8x8xf32>
    %93 = tpu.matmul %3, %92, %cst_85 {dimension_numbers = #tpu.dot_dimension_numbers<[1], [0], [0], [1], [0, 0, 1, 1], [], []>} : vector<8x32xf32>, vector<32x8xf32>, vector<8x8xf32> -> vector<8x8xf32>
    %c0_86 = arith.constant 0 : index
    %c2_87 = arith.constant 2 : index
    %c0_88 = arith.constant 0 : index
    %c0_89 = arith.constant 0 : index
    %94 = vector.load %arg4[%c0_86, %c2_87, %c0_88, %c0_89] : memref<1x4x1x8xf32, #tpu.memory_space<vmem>>, vector<1x1x1x8xf32>
    %95 = vector.shape_cast %94 : vector<1x1x1x8xf32> to vector<1x8xf32>
    %96 = vector.broadcast %95 : vector<1x8xf32> to vector<8x8xf32>
    %97 = arith.addf %93, %96 : vector<8x8xf32>
    %c0_90 = arith.constant 0 : index
    %c2_91 = arith.constant 2 : index
    %c0_92 = arith.constant 0 : index
    %c0_93 = arith.constant 0 : index
    %98 = vector.load %arg5[%c0_90, %c2_91, %c0_92, %c0_93] : memref<1x4x32x8xf32, #tpu.memory_space<vmem>>, vector<1x1x32x8xf32>
    %99 = vector.shape_cast %98 : vector<1x1x32x8xf32> to vector<32x8xf32>
    %cst_94 = arith.constant dense<0.000000e+00> : vector<8x8xf32>
    %100 = tpu.matmul %3, %99, %cst_94 {dimension_numbers = #tpu.dot_dimension_numbers<[1], [0], [0], [1], [0, 0, 1, 1], [], []>} : vector<8x32xf32>, vector<32x8xf32>, vector<8x8xf32> -> vector<8x8xf32>
    %c0_95 = arith.constant 0 : index
    %c2_96 = arith.constant 2 : index
    %c0_97 = arith.constant 0 : index
    %c0_98 = arith.constant 0 : index
    %101 = vector.load %arg6[%c0_95, %c2_96, %c0_97, %c0_98] : memref<1x4x1x8xf32, #tpu.memory_space<vmem>>, vector<1x1x1x8xf32>
    %102 = vector.shape_cast %101 : vector<1x1x1x8xf32> to vector<1x8xf32>
    %103 = vector.broadcast %102 : vector<1x8xf32> to vector<8x8xf32>
    %104 = arith.addf %100, %103 : vector<8x8xf32>
    %c0_99 = arith.constant 0 : index
    %c2_100 = arith.constant 2 : index
    %c0_101 = arith.constant 0 : index
    %c0_102 = arith.constant 0 : index
    %105 = vector.load %arg7[%c0_99, %c2_100, %c0_101, %c0_102] : memref<1x4x32x8xf32, #tpu.memory_space<vmem>>, vector<1x1x32x8xf32>
    %106 = vector.shape_cast %105 : vector<1x1x32x8xf32> to vector<32x8xf32>
    %cst_103 = arith.constant dense<0.000000e+00> : vector<8x8xf32>
    %107 = tpu.matmul %3, %106, %cst_103 {dimension_numbers = #tpu.dot_dimension_numbers<[1], [0], [0], [1], [0, 0, 1, 1], [], []>} : vector<8x32xf32>, vector<32x8xf32>, vector<8x8xf32> -> vector<8x8xf32>
    %c0_104 = arith.constant 0 : index
    %c2_105 = arith.constant 2 : index
    %c0_106 = arith.constant 0 : index
    %c0_107 = arith.constant 0 : index
    %108 = vector.load %arg8[%c0_104, %c2_105, %c0_106, %c0_107] : memref<1x4x1x8xf32, #tpu.memory_space<vmem>>, vector<1x1x1x8xf32>
    %109 = vector.shape_cast %108 : vector<1x1x1x8xf32> to vector<1x8xf32>
    %110 = vector.broadcast %109 : vector<1x8xf32> to vector<8x8xf32>
    %111 = arith.addf %107, %110 : vector<8x8xf32>
    %112 = tpu.transpose %104, [1, 0] : vector<8x8xf32> -> vector<8x8xf32>
    %cst_108 = arith.constant dense<0.000000e+00> : vector<8x8xf32>
    %113 = tpu.matmul %97, %112, %cst_108 {dimension_numbers = #tpu.dot_dimension_numbers<[1], [0], [0], [1], [0, 0, 1, 1], [], []>} : vector<8x8xf32>, vector<8x8xf32>, vector<8x8xf32> -> vector<8x8xf32>
    %cst_109 = arith.constant 0.353553385 : f32
    %114 = vector.broadcast %cst_109 : f32 to vector<8x8xf32>
    %115 = arith.mulf %113, %114 : vector<8x8xf32>
    %cst_110 = arith.constant dense<0xFF800000> : vector<8xf32>
    %116 = vector.multi_reduction <maximumf>, %115, %cst_110 [1] : vector<8x8xf32> to vector<8xf32>
    %117 = vector.shape_cast %116 : vector<8xf32> to vector<8x1xf32>
    %118 = vector.broadcast %117 : vector<8x1xf32> to vector<8x8xf32>
    %119 = arith.subf %115, %118 : vector<8x8xf32>
    %120 = math.exp %119 : vector<8x8xf32>
    %cst_111 = arith.constant dense<0.000000e+00> : vector<8xf32>
    %121 = vector.multi_reduction <add>, %120, %cst_111 [1] : vector<8x8xf32> to vector<8xf32>
    %122 = vector.shape_cast %121 : vector<8xf32> to vector<8x1xf32>
    %123 = tpu.reciprocal %122 {approx = true} : vector<8x1xf32> -> vector<8x1xf32>
    %124 = vector.broadcast %123 : vector<8x1xf32> to vector<8x8xf32>
    %125 = arith.mulf %120, %124 : vector<8x8xf32>
    %c0_112 = arith.constant 0 : index
    %c0_113 = arith.constant 0 : index
    %c0_114 = arith.constant 0 : index
    %c16 = arith.constant 16 : index
    %126 = vector.load %arg22[%c0_112, %c0_113, %c0_114, %c16] : memref<1x1x8x32xf32, #tpu.memory_space<vmem>>, vector<1x1x8x8xf32>
    %127 = vector.shape_cast %126 : vector<1x1x8x8xf32> to vector<8x8xf32>
    %128 = vector.shape_cast %125 : vector<8x8xf32> to vector<1x1x8x8xf32>
    tpu.vector_store %arg22[%c0_112, %c0_113, %c0_114, %c16], %128 {strides = array<i32>} : memref<1x1x8x32xf32, #tpu.memory_space<vmem>>, vector<1x1x8x8xf32>,
    %cst_115 = arith.constant dense<0.000000e+00> : vector<8x8xf32>
    %129 = tpu.matmul %125, %111, %cst_115 {dimension_numbers = #tpu.dot_dimension_numbers<[1], [0], [0], [1], [0, 0, 1, 1], [], []>} : vector<8x8xf32>, vector<8x8xf32>, vector<8x8xf32> -> vector<8x8xf32>
    %c0_116 = arith.constant 0 : index
    %c2_117 = arith.constant 2 : index
    %c0_118 = arith.constant 0 : index
    %c0_119 = arith.constant 0 : index
    %130 = vector.load %arg9[%c0_116, %c2_117, %c0_118, %c0_119] : memref<1x4x8x32xf32, #tpu.memory_space<vmem>>, vector<1x1x8x32xf32>
    %131 = vector.shape_cast %130 : vector<1x1x8x32xf32> to vector<8x32xf32>
    %cst_120 = arith.constant dense<0.000000e+00> : vector<8x32xf32>
    %132 = tpu.matmul %129, %131, %cst_120 {dimension_numbers = #tpu.dot_dimension_numbers<[1], [0], [0], [1], [0, 0, 1, 1], [], []>} : vector<8x8xf32>, vector<8x32xf32>, vector<8x32xf32> -> vector<8x32xf32>
    %133 = arith.addf %90, %132 : vector<8x32xf32>
    %c0_121 = arith.constant 0 : index
    %c3 = arith.constant 3 : index
    %c0_122 = arith.constant 0 : index
    %c0_123 = arith.constant 0 : index
    %134 = vector.load %arg3[%c0_121, %c3, %c0_122, %c0_123] : memref<1x4x32x8xf32, #tpu.memory_space<vmem>>, vector<1x1x32x8xf32>
    %135 = vector.shape_cast %134 : vector<1x1x32x8xf32> to vector<32x8xf32>
    %cst_124 = arith.constant dense<0.000000e+00> : vector<8x8xf32>
    %136 = tpu.matmul %3, %135, %cst_124 {dimension_numbers = #tpu.dot_dimension_numbers<[1], [0], [0], [1], [0, 0, 1, 1], [], []>} : vector<8x32xf32>, vector<32x8xf32>, vector<8x8xf32> -> vector<8x8xf32>
    %c0_125 = arith.constant 0 : index
    %c3_126 = arith.constant 3 : index
    %c0_127 = arith.constant 0 : index
    %c0_128 = arith.constant 0 : index
    %137 = vector.load %arg4[%c0_125, %c3_126, %c0_127, %c0_128] : memref<1x4x1x8xf32, #tpu.memory_space<vmem>>, vector<1x1x1x8xf32>
    %138 = vector.shape_cast %137 : vector<1x1x1x8xf32> to vector<1x8xf32>
    %139 = vector.broadcast %138 : vector<1x8xf32> to vector<8x8xf32>
    %140 = arith.addf %136, %139 : vector<8x8xf32>
    %c0_129 = arith.constant 0 : index
    %c3_130 = arith.constant 3 : index
    %c0_131 = arith.constant 0 : index
    %c0_132 = arith.constant 0 : index
    %141 = vector.load %arg5[%c0_129, %c3_130, %c0_131, %c0_132] : memref<1x4x32x8xf32, #tpu.memory_space<vmem>>, vector<1x1x32x8xf32>
    %142 = vector.shape_cast %141 : vector<1x1x32x8xf32> to vector<32x8xf32>
    %cst_133 = arith.constant dense<0.000000e+00> : vector<8x8xf32>
    %143 = tpu.matmul %3, %142, %cst_133 {dimension_numbers = #tpu.dot_dimension_numbers<[1], [0], [0], [1], [0, 0, 1, 1], [], []>} : vector<8x32xf32>, vector<32x8xf32>, vector<8x8xf32> -> vector<8x8xf32>
    %c0_134 = arith.constant 0 : index
    %c3_135 = arith.constant 3 : index
    %c0_136 = arith.constant 0 : index
    %c0_137 = arith.constant 0 : index
    %144 = vector.load %arg6[%c0_134, %c3_135, %c0_136, %c0_137] : memref<1x4x1x8xf32, #tpu.memory_space<vmem>>, vector<1x1x1x8xf32>
    %145 = vector.shape_cast %144 : vector<1x1x1x8xf32> to vector<1x8xf32>
    %146 = vector.broadcast %145 : vector<1x8xf32> to vector<8x8xf32>
    %147 = arith.addf %143, %146 : vector<8x8xf32>
    %c0_138 = arith.constant 0 : index
    %c3_139 = arith.constant 3 : index
    %c0_140 = arith.constant 0 : index
    %c0_141 = arith.constant 0 : index
    %148 = vector.load %arg7[%c0_138, %c3_139, %c0_140, %c0_141] : memref<1x4x32x8xf32, #tpu.memory_space<vmem>>, vector<1x1x32x8xf32>
    %149 = vector.shape_cast %148 : vector<1x1x32x8xf32> to vector<32x8xf32>
    %cst_142 = arith.constant dense<0.000000e+00> : vector<8x8xf32>
    %150 = tpu.matmul %3, %149, %cst_142 {dimension_numbers = #tpu.dot_dimension_numbers<[1], [0], [0], [1], [0, 0, 1, 1], [], []>} : vector<8x32xf32>, vector<32x8xf32>, vector<8x8xf32> -> vector<8x8xf32>
    %c0_143 = arith.constant 0 : index
    %c3_144 = arith.constant 3 : index
    %c0_145 = arith.constant 0 : index
    %c0_146 = arith.constant 0 : index
    %151 = vector.load %arg8[%c0_143, %c3_144, %c0_145, %c0_146] : memref<1x4x1x8xf32, #tpu.memory_space<vmem>>, vector<1x1x1x8xf32>
    %152 = vector.shape_cast %151 : vector<1x1x1x8xf32> to vector<1x8xf32>
    %153 = vector.broadcast %152 : vector<1x8xf32> to vector<8x8xf32>
    %154 = arith.addf %150, %153 : vector<8x8xf32>
    %155 = tpu.transpose %147, [1, 0] : vector<8x8xf32> -> vector<8x8xf32>
    %cst_147 = arith.constant dense<0.000000e+00> : vector<8x8xf32>
    %156 = tpu.matmul %140, %155, %cst_147 {dimension_numbers = #tpu.dot_dimension_numbers<[1], [0], [0], [1], [0, 0, 1, 1], [], []>} : vector<8x8xf32>, vector<8x8xf32>, vector<8x8xf32> -> vector<8x8xf32>
    %cst_148 = arith.constant 0.353553385 : f32
    %157 = vector.broadcast %cst_148 : f32 to vector<8x8xf32>
    %158 = arith.mulf %156, %157 : vector<8x8xf32>
    %cst_149 = arith.constant dense<0xFF800000> : vector<8xf32>
    %159 = vector.multi_reduction <maximumf>, %158, %cst_149 [1] : vector<8x8xf32> to vector<8xf32>
    %160 = vector.shape_cast %159 : vector<8xf32> to vector<8x1xf32>
    %161 = vector.broadcast %160 : vector<8x1xf32> to vector<8x8xf32>
    %162 = arith.subf %158, %161 : vector<8x8xf32>
    %163 = math.exp %162 : vector<8x8xf32>
    %cst_150 = arith.constant dense<0.000000e+00> : vector<8xf32>
    %164 = vector.multi_reduction <add>, %163, %cst_150 [1] : vector<8x8xf32> to vector<8xf32>
    %165 = vector.shape_cast %164 : vector<8xf32> to vector<8x1xf32>
    %166 = tpu.reciprocal %165 {approx = true} : vector<8x1xf32> -> vector<8x1xf32>
    %167 = vector.broadcast %166 : vector<8x1xf32> to vector<8x8xf32>
    %168 = arith.mulf %163, %167 : vector<8x8xf32>
    %c0_151 = arith.constant 0 : index
    %c0_152 = arith.constant 0 : index
    %c0_153 = arith.constant 0 : index
    %c24 = arith.constant 24 : index
    %169 = vector.load %arg22[%c0_151, %c0_152, %c0_153, %c24] : memref<1x1x8x32xf32, #tpu.memory_space<vmem>>, vector<1x1x8x8xf32>
    %170 = vector.shape_cast %169 : vector<1x1x8x8xf32> to vector<8x8xf32>
    %171 = vector.shape_cast %168 : vector<8x8xf32> to vector<1x1x8x8xf32>
    tpu.vector_store %arg22[%c0_151, %c0_152, %c0_153, %c24], %171 {strides = array<i32>} : memref<1x1x8x32xf32, #tpu.memory_space<vmem>>, vector<1x1x8x8xf32>,
    %cst_154 = arith.constant dense<0.000000e+00> : vector<8x8xf32>
    %172 = tpu.matmul %168, %154, %cst_154 {dimension_numbers = #tpu.dot_dimension_numbers<[1], [0], [0], [1], [0, 0, 1, 1], [], []>} : vector<8x8xf32>, vector<8x8xf32>, vector<8x8xf32> -> vector<8x8xf32>
    %c0_155 = arith.constant 0 : index
    %c3_156 = arith.constant 3 : index
    %c0_157 = arith.constant 0 : index
    %c0_158 = arith.constant 0 : index
    %173 = vector.load %arg9[%c0_155, %c3_156, %c0_157, %c0_158] : memref<1x4x8x32xf32, #tpu.memory_space<vmem>>, vector<1x1x8x32xf32>
    %174 = vector.shape_cast %173 : vector<1x1x8x32xf32> to vector<8x32xf32>
    %cst_159 = arith.constant dense<0.000000e+00> : vector<8x32xf32>
    %175 = tpu.matmul %172, %174, %cst_159 {dimension_numbers = #tpu.dot_dimension_numbers<[1], [0], [0], [1], [0, 0, 1, 1], [], []>} : vector<8x8xf32>, vector<8x32xf32>, vector<8x32xf32> -> vector<8x32xf32>
    %176 = arith.addf %133, %175 : vector<8x32xf32>
    %c0_160 = arith.constant 0 : index
    %c0_161 = arith.constant 0 : index
    %c0_162 = arith.constant 0 : index
    %177 = vector.load %arg10[%c0_160, %c0_161, %c0_162] : memref<1x1x32xf32, #tpu.memory_space<vmem>>, vector<1x1x32xf32>
    %178 = vector.shape_cast %177 : vector<1x1x32xf32> to vector<1x32xf32>
    %179 = vector.broadcast %178 : vector<1x32xf32> to vector<8x32xf32>
    %180 = arith.addf %176, %179 : vector<8x32xf32>
    %181 = arith.addf %3, %180 : vector<8x32xf32>
    %c0_163 = arith.constant 0 : index
    %c0_164 = arith.constant 0 : index
    %c0_165 = arith.constant 0 : index
    %182 = vector.load %arg11[%c0_163, %c0_164, %c0_165] : memref<1x1x32xf32, #tpu.memory_space<vmem>>, vector<1x1x32xf32>
    %183 = vector.shape_cast %182 : vector<1x1x32xf32> to vector<1x32xf32>
    %c0_166 = arith.constant 0 : index
    %c0_167 = arith.constant 0 : index
    %c0_168 = arith.constant 0 : index
    %184 = vector.load %arg12[%c0_166, %c0_167, %c0_168] : memref<1x1x32xf32, #tpu.memory_space<vmem>>, vector<1x1x32xf32>
    %185 = vector.shape_cast %184 : vector<1x1x32xf32> to vector<1x32xf32>
    %cst_169 = arith.constant dense<0.000000e+00> : vector<8xf32>
    %186 = vector.multi_reduction <add>, %181, %cst_169 [1] : vector<8x32xf32> to vector<8xf32>
    %187 = vector.shape_cast %186 : vector<8xf32> to vector<8x1xf32>
    %cst_170 = arith.constant 3.200000e+01 : f32
    %188 = vector.broadcast %cst_170 : f32 to vector<8x1xf32>
    %189 = arith.divf %187, %188 : vector<8x1xf32>
    %190 = vector.broadcast %189 : vector<8x1xf32> to vector<8x32xf32>
    %191 = arith.subf %181, %190 : vector<8x32xf32>
    %192 = arith.mulf %191, %191 : vector<8x32xf32>
    %cst_171 = arith.constant dense<0.000000e+00> : vector<8xf32>
    %193 = vector.multi_reduction <add>, %192, %cst_171 [1] : vector<8x32xf32> to vector<8xf32>
    %194 = vector.shape_cast %193 : vector<8xf32> to vector<8x1xf32>
    %cst_172 = arith.constant 3.200000e+01 : f32
    %195 = vector.broadcast %cst_172 : f32 to vector<8x1xf32>
    %196 = arith.divf %194, %195 : vector<8x1xf32>
    %cst_173 = arith.constant 9.99999974E-6 : f32
    %197 = vector.broadcast %cst_173 : f32 to vector<8x1xf32>
    %198 = arith.addf %196, %197 : vector<8x1xf32>
    %199 = math.rsqrt %198 : vector<8x1xf32>
    %200 = vector.broadcast %199 : vector<8x1xf32> to vector<8x32xf32>
    %201 = arith.mulf %191, %200 : vector<8x32xf32>
    %202 = vector.broadcast %183 : vector<1x32xf32> to vector<8x32xf32>
    %203 = arith.mulf %201, %202 : vector<8x32xf32>
    %204 = vector.broadcast %185 : vector<1x32xf32> to vector<8x32xf32>
    %205 = arith.addf %203, %204 : vector<8x32xf32>
    %c0_174 = arith.constant 0 : index
    %c0_175 = arith.constant 0 : index
    %c0_176 = arith.constant 0 : index
    %206 = vector.load %arg13[%c0_174, %c0_175, %c0_176] : memref<1x32x64xf32, #tpu.memory_space<vmem>>, vector<1x32x64xf32>
    %207 = vector.shape_cast %206 : vector<1x32x64xf32> to vector<32x64xf32>
    %cst_177 = arith.constant dense<0.000000e+00> : vector<8x64xf32>
    %208 = tpu.matmul %205, %207, %cst_177 {dimension_numbers = #tpu.dot_dimension_numbers<[1], [0], [0], [1], [0, 0, 1, 1], [], []>} : vector<8x32xf32>, vector<32x64xf32>, vector<8x64xf32> -> vector<8x64xf32>
    %c0_178 = arith.constant 0 : index
    %c0_179 = arith.constant 0 : index
    %c0_180 = arith.constant 0 : index
    %209 = vector.load %arg14[%c0_178, %c0_179, %c0_180] : memref<1x1x64xf32, #tpu.memory_space<vmem>>, vector<1x1x64xf32>
    %210 = vector.shape_cast %209 : vector<1x1x64xf32> to vector<1x64xf32>
    %211 = vector.broadcast %210 : vector<1x64xf32> to vector<8x64xf32>
    %212 = arith.addf %208, %211 : vector<8x64xf32>
    %cst_181 = arith.constant 0.000000e+00 : f32
    %213 = vector.broadcast %cst_181 : f32 to vector<8x64xf32>
    %214 = arith.maximumf %212, %213 : vector<8x64xf32>
    %c0_182 = arith.constant 0 : index
    %c0_183 = arith.constant 0 : index
    %c0_184 = arith.constant 0 : index
    %215 = vector.load %arg15[%c0_182, %c0_183, %c0_184] : memref<1x64x32xf32, #tpu.memory_space<vmem>>, vector<1x64x32xf32>
    %216 = vector.shape_cast %215 : vector<1x64x32xf32> to vector<64x32xf32>
    %cst_185 = arith.constant dense<0.000000e+00> : vector<8x32xf32>
    %217 = tpu.matmul %214, %216, %cst_185 {dimension_numbers = #tpu.dot_dimension_numbers<[1], [0], [0], [1], [0, 0, 1, 1], [], []>} : vector<8x64xf32>, vector<64x32xf32>, vector<8x32xf32> -> vector<8x32xf32>
    %c0_186 = arith.constant 0 : index
    %c0_187 = arith.constant 0 : index
    %c0_188 = arith.constant 0 : index
    %218 = vector.load %arg16[%c0_186, %c0_187, %c0_188] : memref<1x1x32xf32, #tpu.memory_space<vmem>>, vector<1x1x32xf32>
    %219 = vector.shape_cast %218 : vector<1x1x32xf32> to vector<1x32xf32>
    %220 = vector.broadcast %219 : vector<1x32xf32> to vector<8x32xf32>
    %221 = arith.addf %217, %220 : vector<8x32xf32>
    %222 = arith.addf %205, %221 : vector<8x32xf32>
    %c0_189 = arith.constant 0 : index
    %c0_190 = arith.constant 0 : index
    %c0_191 = arith.constant 0 : index
    %223 = vector.load %arg17[%c0_189, %c0_190, %c0_191] : memref<1x1x32xf32, #tpu.memory_space<vmem>>, vector<1x1x32xf32>
    %224 = vector.shape_cast %223 : vector<1x1x32xf32> to vector<1x32xf32>
    %c0_192 = arith.constant 0 : index
    %c0_193 = arith.constant 0 : index
    %c0_194 = arith.constant 0 : index
    %225 = vector.load %arg18[%c0_192, %c0_193, %c0_194] : memref<1x1x32xf32, #tpu.memory_space<vmem>>, vector<1x1x32xf32>
    %226 = vector.shape_cast %225 : vector<1x1x32xf32> to vector<1x32xf32>
    %cst_195 = arith.constant dense<0.000000e+00> : vector<8xf32>
    %227 = vector.multi_reduction <add>, %222, %cst_195 [1] : vector<8x32xf32> to vector<8xf32>
    %228 = vector.shape_cast %227 : vector<8xf32> to vector<8x1xf32>
    %cst_196 = arith.constant 3.200000e+01 : f32
    %229 = vector.broadcast %cst_196 : f32 to vector<8x1xf32>
    %230 = arith.divf %228, %229 : vector<8x1xf32>
    %231 = vector.broadcast %230 : vector<8x1xf32> to vector<8x32xf32>
    %232 = arith.subf %222, %231 : vector<8x32xf32>
    %233 = arith.mulf %232, %232 : vector<8x32xf32>
    %cst_197 = arith.constant dense<0.000000e+00> : vector<8xf32>
    %234 = vector.multi_reduction <add>, %233, %cst_197 [1] : vector<8x32xf32> to vector<8xf32>
    %235 = vector.shape_cast %234 : vector<8xf32> to vector<8x1xf32>
    %cst_198 = arith.constant 3.200000e+01 : f32
    %236 = vector.broadcast %cst_198 : f32 to vector<8x1xf32>
    %237 = arith.divf %235, %236 : vector<8x1xf32>
    %cst_199 = arith.constant 9.99999974E-6 : f32
    %238 = vector.broadcast %cst_199 : f32 to vector<8x1xf32>
    %239 = arith.addf %237, %238 : vector<8x1xf32>
    %240 = math.rsqrt %239 : vector<8x1xf32>
    %241 = vector.broadcast %240 : vector<8x1xf32> to vector<8x32xf32>
    %242 = arith.mulf %232, %241 : vector<8x32xf32>
    %243 = vector.broadcast %224 : vector<1x32xf32> to vector<8x32xf32>
    %244 = arith.mulf %242, %243 : vector<8x32xf32>
    %245 = vector.broadcast %226 : vector<1x32xf32> to vector<8x32xf32>
    %246 = arith.addf %244, %245 : vector<8x32xf32>
    %c0_200 = arith.constant 0 : index
    %c0_201 = arith.constant 0 : index
    %247 = vector.load %arg23[%c0_200, %c0_201] : memref<8x32xf32, #tpu.memory_space<vmem>>, vector<8x32xf32>
    tpu.vector_store %arg23[%c0_200, %c0_201], %246 {strides = array<i32>} : memref<8x32xf32, #tpu.memory_space<vmem>>, vector<8x32xf32>,
    %c1_i32 = arith.constant 1 : i32
    %248 = arith.cmpi eq, %arg1, %c1_i32 : i32
    %249 = arith.extui %248 : i1 to i32
    %c0_i32_202 = arith.constant 0 : i32
    %250 = arith.cmpi ne, %249, %c0_i32_202 : i32
    scf.if %250 {
      %c0_203 = arith.constant 0 : index
      %c0_204 = arith.constant 0 : index
      %251 = vector.load %arg19[%c0_203, %c0_204] : memref<1x32xf32, #tpu.memory_space<vmem>>, vector<1x32xf32>
      %c0_205 = arith.constant 0 : index
      %c0_206 = arith.constant 0 : index
      %252 = vector.load %arg20[%c0_205, %c0_206] : memref<1x32xf32, #tpu.memory_space<vmem>>, vector<1x32xf32>
      %cst_207 = arith.constant dense<0.000000e+00> : vector<8xf32>
      %253 = vector.multi_reduction <add>, %246, %cst_207 [1] : vector<8x32xf32> to vector<8xf32>
      %254 = vector.shape_cast %253 : vector<8xf32> to vector<8x1xf32>
      %cst_208 = arith.constant 3.200000e+01 : f32
      %255 = vector.broadcast %cst_208 : f32 to vector<8x1xf32>
      %256 = arith.divf %254, %255 : vector<8x1xf32>
      %257 = vector.broadcast %256 : vector<8x1xf32> to vector<8x32xf32>
      %258 = arith.subf %246, %257 : vector<8x32xf32>
      %259 = arith.mulf %258, %258 : vector<8x32xf32>
      %cst_209 = arith.constant dense<0.000000e+00> : vector<8xf32>
      %260 = vector.multi_reduction <add>, %259, %cst_209 [1] : vector<8x32xf32> to vector<8xf32>
      %261 = vector.shape_cast %260 : vector<8xf32> to vector<8x1xf32>
      %cst_210 = arith.constant 3.200000e+01 : f32
      %262 = vector.broadcast %cst_210 : f32 to vector<8x1xf32>
      %263 = arith.divf %261, %262 : vector<8x1xf32>
      %cst_211 = arith.constant 9.99999974E-6 : f32
      %264 = vector.broadcast %cst_211 : f32 to vector<8x1xf32>
      %265 = arith.addf %263, %264 : vector<8x1xf32>
      %266 = math.rsqrt %265 : vector<8x1xf32>
      %267 = vector.broadcast %266 : vector<8x1xf32> to vector<8x32xf32>
      %268 = arith.mulf %258, %267 : vector<8x32xf32>
      %269 = vector.broadcast %251 : vector<1x32xf32> to vector<8x32xf32>
      %270 = arith.mulf %268, %269 : vector<8x32xf32>
      %271 = vector.broadcast %252 : vector<1x32xf32> to vector<8x32xf32>
      %272 = arith.addf %270, %271 : vector<8x32xf32>
      %c0_212 = arith.constant 0 : index
      %c0_213 = arith.constant 0 : index
      %c0_214 = arith.constant 0 : index
      %273 = vector.load %arg21[%c0_212, %c0_213, %c0_214] : memref<1x8x32xf32, #tpu.memory_space<vmem>>, vector<1x8x32xf32>
      %274 = vector.shape_cast %273 : vector<1x8x32xf32> to vector<8x32xf32>
      %275 = vector.shape_cast %272 : vector<8x32xf32> to vector<1x8x32xf32>
      tpu.vector_store %arg21[%c0_212, %c0_213, %c0_214], %275 {strides = array<i32>} : memref<1x8x32xf32, #tpu.memory_space<vmem>>, vector<1x8x32xf32>,
    } else {
    }
    return
  }
  func.func @transform_0(%arg0: i32, %arg1: i32) -> (i32, i32, i32) {
    %c0_i32 = arith.constant 0 : i32
    %c0_i32_0 = arith.constant 0 : i32
    %c0_i32_1 = arith.constant 0 : i32
    return %arg0, %c0_i32, %c0_i32_0 : i32, i32, i32
  }
  func.func @transform_1(%arg0: i32, %arg1: i32) -> (i32, i32, i32, i32) {
    %c0_i32 = arith.constant 0 : i32
    %c0_i32_0 = arith.constant 0 : i32
    %c0_i32_1 = arith.constant 0 : i32
    %c0_i32_2 = arith.constant 0 : i32
    return %arg1, %c0_i32, %c0_i32_0, %c0_i32_1 : i32, i32, i32, i32
  }
  func.func @transform_2(%arg0: i32, %arg1: i32) -> (i32, i32, i32, i32) {
    %c0_i32 = arith.constant 0 : i32
    %c0_i32_0 = arith.constant 0 : i32
    %c0_i32_1 = arith.constant 0 : i32
    %c0_i32_2 = arith.constant 0 : i32
    return %arg1, %c0_i32, %c0_i32_0, %c0_i32_1 : i32, i32, i32, i32
  }
  func.func @transform_3(%arg0: i32, %arg1: i32) -> (i32, i32, i32, i32) {
    %c0_i32 = arith.constant 0 : i32
    %c0_i32_0 = arith.constant 0 : i32
    %c0_i32_1 = arith.constant 0 : i32
    %c0_i32_2 = arith.constant 0 : i32
    return %arg1, %c0_i32, %c0_i32_0, %c0_i32_1 : i32, i32, i32, i32
  }
  func.func @transform_4(%arg0: i32, %arg1: i32) -> (i32, i32, i32, i32) {
    %c0_i32 = arith.constant 0 : i32
    %c0_i32_0 = arith.constant 0 : i32
    %c0_i32_1 = arith.constant 0 : i32
    %c0_i32_2 = arith.constant 0 : i32
    return %arg1, %c0_i32, %c0_i32_0, %c0_i32_1 : i32, i32, i32, i32
  }
  func.func @transform_5(%arg0: i32, %arg1: i32) -> (i32, i32, i32, i32) {
    %c0_i32 = arith.constant 0 : i32
    %c0_i32_0 = arith.constant 0 : i32
    %c0_i32_1 = arith.constant 0 : i32
    %c0_i32_2 = arith.constant 0 : i32
    return %arg1, %c0_i32, %c0_i32_0, %c0_i32_1 : i32, i32, i32, i32
  }
  func.func @transform_6(%arg0: i32, %arg1: i32) -> (i32, i32, i32, i32) {
    %c0_i32 = arith.constant 0 : i32
    %c0_i32_0 = arith.constant 0 : i32
    %c0_i32_1 = arith.constant 0 : i32
    %c0_i32_2 = arith.constant 0 : i32
    return %arg1, %c0_i32, %c0_i32_0, %c0_i32_1 : i32, i32, i32, i32
  }
  func.func @transform_7(%arg0: i32, %arg1: i32) -> (i32, i32, i32, i32) {
    %c0_i32 = arith.constant 0 : i32
    %c0_i32_0 = arith.constant 0 : i32
    %c0_i32_1 = arith.constant 0 : i32
    %c0_i32_2 = arith.constant 0 : i32
    return %arg1, %c0_i32, %c0_i32_0, %c0_i32_1 : i32, i32, i32, i32
  }
  func.func @transform_8(%arg0: i32, %arg1: i32) -> (i32, i32, i32) {
    %c0_i32 = arith.constant 0 : i32
    %c0_i32_0 = arith.constant 0 : i32
    %c0_i32_1 = arith.constant 0 : i32
    return %arg1, %c0_i32, %c0_i32_0 : i32, i32, i32
  }
  func.func @transform_9(%arg0: i32, %arg1: i32) -> (i32, i32, i32) {
    %c0_i32 = arith.constant 0 : i32
    %c0_i32_0 = arith.constant 0 : i32
    %c0_i32_1 = arith.constant 0 : i32
    return %arg1, %c0_i32, %c0_i32_0 : i32, i32, i32
  }
  func.func @transform_10(%arg0: i32, %arg1: i32) -> (i32, i32, i32) {
    %c0_i32 = arith.constant 0 : i32
    %c0_i32_0 = arith.constant 0 : i32
    %c0_i32_1 = arith.constant 0 : i32
    return %arg1, %c0_i32, %c0_i32_0 : i32, i32, i32
  }
  func.func @transform_11(%arg0: i32, %arg1: i32) -> (i32, i32, i32) {
    %c0_i32 = arith.constant 0 : i32
    %c0_i32_0 = arith.constant 0 : i32
    %c0_i32_1 = arith.constant 0 : i32
    return %arg1, %c0_i32, %c0_i32_0 : i32, i32, i32
  }
  func.func @transform_12(%arg0: i32, %arg1: i32) -> (i32, i32, i32) {
    %c0_i32 = arith.constant 0 : i32
    %c0_i32_0 = arith.constant 0 : i32
    %c0_i32_1 = arith.constant 0 : i32
    return %arg1, %c0_i32, %c0_i32_0 : i32, i32, i32
  }
  func.func @transform_13(%arg0: i32, %arg1: i32) -> (i32, i32, i32) {
    %c0_i32 = arith.constant 0 : i32
    %c0_i32_0 = arith.constant 0 : i32
    %c0_i32_1 = arith.constant 0 : i32
    return %arg1, %c0_i32, %c0_i32_0 : i32, i32, i32
  }
  func.func @transform_14(%arg0: i32, %arg1: i32) -> (i32, i32, i32) {
    %c0_i32 = arith.constant 0 : i32
    %c0_i32_0 = arith.constant 0 : i32
    %c0_i32_1 = arith.constant 0 : i32
    return %arg1, %c0_i32, %c0_i32_0 : i32, i32, i32
  }
  func.func @transform_15(%arg0: i32, %arg1: i32) -> (i32, i32, i32) {
    %c0_i32 = arith.constant 0 : i32
    %c0_i32_0 = arith.constant 0 : i32
    %c0_i32_1 = arith.constant 0 : i32
    return %arg1, %c0_i32, %c0_i32_0 : i32, i32, i32
  }
  func.func @transform_16(%arg0: i32, %arg1: i32) -> (i32, i32, i32) {
    %c0_i32 = arith.constant 0 : i32
    %c0_i32_0 = arith.constant 0 : i32
    %c0_i32_1 = arith.constant 0 : i32
    return %arg1, %c0_i32, %c0_i32_0 : i32, i32, i32
  }
  func.func @transform_17(%arg0: i32, %arg1: i32) -> (i32, i32) {
    %c0_i32 = arith.constant 0 : i32
    %c0_i32_0 = arith.constant 0 : i32
    %c0_i32_1 = arith.constant 0 : i32
    return %c0_i32, %c0_i32_0 : i32, i32
  }
  func.func @transform_18(%arg0: i32, %arg1: i32) -> (i32, i32) {
    %c0_i32 = arith.constant 0 : i32
    %c0_i32_0 = arith.constant 0 : i32
    %c0_i32_1 = arith.constant 0 : i32
    return %c0_i32, %c0_i32_0 : i32, i32
  }
  func.func @transform_19(%arg0: i32, %arg1: i32) -> (i32, i32, i32) {
    %c0_i32 = arith.constant 0 : i32
    %c0_i32_0 = arith.constant 0 : i32
    %c0_i32_1 = arith.constant 0 : i32
    return %arg0, %c0_i32, %c0_i32_0 : i32, i32, i32
  }
  func.func @transform_20(%arg0: i32, %arg1: i32) -> (i32, i32, i32, i32) {
    %c0_i32 = arith.constant 0 : i32
    %c0_i32_0 = arith.constant 0 : i32
    %c0_i32_1 = arith.constant 0 : i32
    return %arg1, %arg0, %c0_i32, %c0_i32_0 : i32, i32, i32, i32
  }
}

</mosaic_0001>

<bundles_post_ra>
// kernel: squeeze.3
= control target key start
LH: loop header
LB: loop body
LE: loop exit
PB: predicated region body
PF: predicated region fallthrough
CT: control target
= control target key end

     0   :  { %vm3_vm0 = vcmask 64512   ;;  %s196_s10 = smov 120   ;;  %s197_s11 = smov 104   ;;  %s278_s0 = inlined_call_operand.vmem [shape: f32[1,2,8,32], index: 0, kind: input, shape index: {}]   ;;  %s279_s1 = inlined_call_operand.vmem [shape: f32[2,8,4,8], index: 1, kind: output, shape index: {}]  }
   0x1   :  { %v30_v0 = vld [vmem:[%s278_s0] sm:$0xff]   ;;  %v175_v1 = vld [vmem:[%s278_s0 + $0x8] sm:$0xff]   ;;  %s195_s0 = smov 112  }
   0x2   :  { %31 = vrot.lane.b32.xlu1 %v30_v0, %s195_s0  ;;  %14 = vrot.lane.b32.xlu0 %v30_v0, %s196_s10  ;;  %10 = vst.msk [vmem:[#allocation0 + $0x40] ss:$8 sm:$0xf] %vm3_vm0, %v175_v1   ;;  %12 = vst.msk [vmem:[#allocation0 + $0x40] ss:$8 sm:$0xf0] %vm3_vm0, %v175_v1  }
   0x3   :  { %4 = vst.msk [vmem:[#allocation0] ss:$8 sm:$0xf] %vm3_vm0, %v30_v0   ;;  %5 = vst.msk [vmem:[#allocation0] ss:$8 sm:$0xf0] %vm3_vm0, %v30_v0  }
   0x6   :  { %40 = vrot.lane.b32.xlu1 %v175_v1, %s195_s0  ;;  %23 = vrot.lane.b32.xlu0 %v175_v1, %s196_s10 }
   0xa   :  { %57 = vrot.lane.b32.xlu1 %v175_v1, %s197_s11  ;;  %48 = vrot.lane.b32.xlu0 %v30_v0, %s197_s11 }
  0x74   :  { %v32_v2 = vpop.permute.xlu1 %31   ;;  %v15_v3 = vpop.permute.xlu0 %14  }
  0x75   :  { %35 = vst.msk [vmem:[#allocation0 + $0x2] ss:$8 sm:$0xf] %vm3_vm0, %v32_v2   ;;  %37 = vst.msk [vmem:[#allocation0 + $0x2] ss:$8 sm:$0xf0] %vm3_vm0, %v32_v2  }
  0x76   :  { %18 = vst.msk [vmem:[#allocation0 + $0x1] ss:$8 sm:$0xf] %vm3_vm0, %v15_v3   ;;  %20 = vst.msk [vmem:[#allocation0 + $0x1] ss:$8 sm:$0xf0] %vm3_vm0, %v15_v3  }
  0x78   :  { %v41_v4 = vpop.permute.xlu1 %40   ;;  %v24_v5 = vpop.permute.xlu0 %23  }
  0x79   :  { %44 = vst.msk [vmem:[#allocation0 + $0x42] ss:$8 sm:$0xf] %vm3_vm0, %v41_v4   ;;  %46 = vst.msk [vmem:[#allocation0 + $0x42] ss:$8 sm:$0xf0] %vm3_vm0, %v41_v4  }
  0x7a   :  { %27 = vst.msk [vmem:[#allocation0 + $0x41] ss:$8 sm:$0xf] %vm3_vm0, %v24_v5   ;;  %29 = vst.msk [vmem:[#allocation0 + $0x41] ss:$8 sm:$0xf0] %vm3_vm0, %v24_v5  }
  0x7c   :  { %v58_v6 = vpop.permute.xlu1 %57   ;;  %v49_v7 = vpop.permute.xlu0 %48  }
  0x7d   :  { %61 = vst.msk [vmem:[#allocation0 + $0x43] ss:$8 sm:$0xf] %vm3_vm0, %v58_v6   ;;  %63 = vst.msk [vmem:[#allocation0 + $0x43] ss:$8 sm:$0xf0] %vm3_vm0, %v58_v6  }
  0x7e   :  { %52 = vst.msk [vmem:[#allocation0 + $0x3] ss:$8 sm:$0xf] %vm3_vm0, %v49_v7   ;;  %54 = vst.msk [vmem:[#allocation0 + $0x3] ss:$8 sm:$0xf0] %vm3_vm0, %v49_v7  }
  0x84   :  { %v112_v8 = vld [vmem:[#allocation0 + $0x40] sm:$0xf]  ;;  %v118_v9 = vld [vmem:[#allocation0 + $0x48] sm:$0xf]  ;;  %v124_v10 = vld [vmem:[#allocation0 + $0x50] sm:$0xf] }
  0x85   :  { %184 = vst [vmem:[%s279_s1 + $0x20] sm:$0xf] %v112_v8  ;;  %185 = vst [vmem:[%s279_s1 + $0x24] sm:$0xf] %v118_v9  ;;  %v130_v11 = vld [vmem:[#allocation0 + $0x58] sm:$0xf] }
  0x86   :  { %186 = vst [vmem:[%s279_s1 + $0x28] sm:$0xf] %v124_v10  ;;  %v136_v12 = vld [vmem:[#allocation0 + $0x60] sm:$0xf]  ;;  %v142_v13 = vld [vmem:[#allocation0 + $0x68] sm:$0xf] }
  0x87   :  { %187 = vst [vmem:[%s279_s1 + $0x2c] sm:$0xf] %v130_v11  ;;  %188 = vst [vmem:[%s279_s1 + $0x30] sm:$0xf] %v136_v12  ;;  %v148_v14 = vld [vmem:[#allocation0 + $0x70] sm:$0xf] }
  0x88   :  { %189 = vst [vmem:[%s279_s1 + $0x34] sm:$0xf] %v142_v13  ;;  %v154_v15 = vld [vmem:[#allocation0 + $0x78] sm:$0xf]  ;;  %v67_v16 = vld [vmem:[#allocation0] sm:$0xf] }
  0x89   :  { %190 = vst [vmem:[%s279_s1 + $0x38] sm:$0xf] %v148_v14  ;;  %191 = vst [vmem:[%s279_s1 + $0x3c] sm:$0xf] %v154_v15  ;;  %v71_v17 = vld [vmem:[#allocation0 + $0x8] sm:$0xf] }
  0x8a   :  { %69 = vst [vmem:[%s279_s1] sm:$0xf] %v67_v16  ;;  %v76_v18 = vld [vmem:[#allocation0 + $0x10] sm:$0xf]  ;;  %v82_v19 = vld [vmem:[#allocation0 + $0x18] sm:$0xf] }
  0x8b   :  { %177 = vst [vmem:[%s279_s1 + $0x4] sm:$0xf] %v71_v17  ;;  %178 = vst [vmem:[%s279_s1 + $0x8] sm:$0xf] %v76_v18  ;;  %v88_v20 = vld [vmem:[#allocation0 + $0x20] sm:$0xf] }
  0x8c   :  { %179 = vst [vmem:[%s279_s1 + $0xc] sm:$0xf] %v82_v19  ;;  %v94_v21 = vld [vmem:[#allocation0 + $0x28] sm:$0xf]  ;;  %v100_v22 = vld [vmem:[#allocation0 + $0x30] sm:$0xf] }
  0x8d   :  { %180 = vst [vmem:[%s279_s1 + $0x10] sm:$0xf] %v88_v20  ;;  %181 = vst [vmem:[%s279_s1 + $0x14] sm:$0xf] %v94_v21  ;;  %v106_v23 = vld [vmem:[#allocation0 + $0x38] sm:$0xf] }
  0x8e   :  { %182 = vst [vmem:[%s279_s1 + $0x18] sm:$0xf] %v100_v22  ;;  %183 = vst [vmem:[%s279_s1 + $0x1c] sm:$0xf] %v106_v23 }

// kernel: msptst_encoder.1
= control target key start
LH: loop header
LB: loop body
LE: loop exit
PB: predicated region body
PF: predicated region fallthrough
CT: control target
= control target key end

     0   :  { %s4840_s0 = inlined_call_operand.vmem [shape: f32[2,8,32], index: 0, kind: input, shape index: {}]   ;;  %s4841_s1 = inlined_call_operand.vmem [shape: f32[2,4,32,8], index: 1, kind: input, shape index: {}]   ;;  %s4842_s2 = inlined_call_operand.vmem [shape: f32[2,4,1,8], index: 2, kind: input, shape index: {}]   ;;  %s4843_s3 = inlined_call_operand.vmem [shape: f32[2,4,32,8], index: 3, kind: input, shape index: {}]   ;;  %s4844_s4 = inlined_call_operand.vmem [shape: f32[2,4,1,8], index: 4, kind: input, shape index: {}]   ;;  %s4845_s5 = inlined_call_operand.vmem [shape: f32[2,4,32,8], index: 5, kind: input, shape index: {}]   ;;  %s4846_s6 = inlined_call_operand.vmem [shape: f32[2,4,1,8], index: 6, kind: input, shape index: {}]   ;;  %s4847_s7 = inlined_call_operand.vmem [shape: f32[2,4,8,32], index: 7, kind: input, shape index: {}]   ;;  %s4848_s8 = inlined_call_operand.vmem [shape: f32[2,1,32], index: 8, kind: input, shape index: {}]   ;;  %s4849_s9 = inlined_call_operand.vmem [shape: f32[2,1,32], index: 9, kind: input, shape index: {}]   ;;  %s4850_s10 = inlined_call_operand.vmem [shape: f32[2,1,32], index: 10, kind: input, shape index: {}]   ;;  %s4851_s11 = inlined_call_operand.vmem [shape: f32[2,32,64], index: 11, kind: input, shape index: {}]   ;;  %s4852_s12 = inlined_call_operand.vmem [shape: f32[2,1,64], index: 12, kind: input, shape index: {}]   ;;  %s4853_s13 = inlined_call_operand.vmem [shape: f32[2,64,32], index: 13, kind: input, shape index: {}]   ;;  %s4854_s14 = inlined_call_operand.vmem [shape: f32[2,1,32], index: 14, kind: input, shape index: {}]   ;;  %s4855_s15 = inlined_call_operand.vmem [shape: f32[2,1,32], index: 15, kind: input, shape index: {}]   ;;  %s4856_s16 = inlined_call_operand.vmem [shape: f32[2,1,32], index: 16, kind: input, shape index: {}]   ;;  %s4857_s17 = inlined_call_operand.vmem [shape: f32[1,32], index: 17, kind: input, shape index: {}]   ;;  %s4858_s18 = inlined_call_operand.vmem [shape: f32[1,32], index: 18, kind: input, shape index: {}]   ;;  %s4859_s19 = inlined_call_operand.hbm [shape: f32[2,8,32], index: 19, kind: output, shape index: {0}]   ;;  %s4860_s20 = inlined_call_operand.vmem [shape: f32[2,2,8,32], index: 20, kind: output, shape index: {1}]  }
   0x1   :  { %4880 = sst [smem:[#allocation23_spill]] %s4840_s0 }
   0x2   :  { %4881 = sst [smem:[#allocation24_spill]] %s4841_s1 }
   0x3   :  { %4882 = sst [smem:[#allocation25_spill]] %s4842_s2 }
   0x4   :  { %4883 = sst [smem:[#allocation26_spill]] %s4843_s3 }
   0x5   :  { %4884 = sst [smem:[#allocation27_spill]] %s4844_s4 }
   0x6   :  { %4885 = sst [smem:[#allocation28_spill]] %s4845_s5 }
   0x7   :  { %4886 = sst [smem:[#allocation29_spill]] %s4846_s6 }
   0x8   :  { %4887 = sst [smem:[#allocation30_spill]] %s4847_s7 }
   0x9   :  { %4888 = sst [smem:[#allocation31_spill]] %s4849_s9 }
   0xa   :  { %4889 = sst [smem:[#allocation32_spill]] %s4850_s10 }
   0xb   :  { %4890 = sst [smem:[#allocation33_spill]] %s4851_s11 }
   0xc   :  { %4891 = sst [smem:[#allocation34_spill]] %s4852_s12 }
   0xd   :  { %4892 = sst [smem:[#allocation35_spill]] %s4855_s15 }
   0xe   :  { %4893 = sst [smem:[#allocation36_spill]] %s4856_s16 }
   0xf   :  { %4894 = sst [smem:[#allocation37_spill]] %s4857_s17 }
  0x10   :  { %4895 = sst [smem:[#allocation38_spill]] %s4858_s18 }
  0x11   :  { %4896 = sst [smem:[#allocation39_spill]] %s4859_s19 }
  0x12   :  { %4897 = sst [smem:[#allocation40_spill]] %s4860_s20 }
  0x13   :  { %26 = vsyncpa [#allocation4], 0 }
  0x14   :  { %28 = vsyncpa [#allocation4 + $0x1], 0  ;;  %s4323_s1 = smov 0   ;;  %s4325_s22 = smov 0  }
  0x15   :  { %s4327_s23 = smov 0   ;;  %s4329_s24 = smov 0  }
  0x16   :  { %s4331_s2 = smov 0   ;;  %s4333_s25 = smov 0  }
  0x17   :  { %s4335_s3 = smov 0   ;;  %s4337_s26 = smov 0  }
  0x18 LB: > { %4898 = sst [smem:[#allocation6_spill]] %s4181_s1  ;;  %s3471_s27 = sadd.s32 4294967295, %s4209_s26   ;;  %s4209_s26 = sphi %s4337_s26, %s34_s26   ;;  %s4205_s3 = sphi %s4335_s3, %s4964_s3   ;;  %s4201_s25 = sphi %s4333_s25, %s4963_s25   ;;  %s4197_s2 = sphi %s4331_s2, %s4962_s2   ;;  %s4193_s24 = sphi %s4329_s24, %s4961_s24   ;;  %s4189_s23 = sphi %s4327_s23, %s4960_s23   ;;  %s4185_s22 = sphi %s4325_s22, %s4959_s22   ;;  %s4181_s1 = sphi %s4323_s1, %s4958_s1  }
  0x19   : > { %4899 = sst [smem:[#allocation7_spill]] %s4185_s22  ;;  %s3472_s28 = sadd.s32 4294967294, %s4209_s26  }
  0x1a   : > { %4900 = sst [smem:[#allocation8_spill]] %s4189_s23  ;;  %s43_s4 = sadd.s32 1, %s4201_s25 }
  0x1b   : > { %4901 = sst [smem:[#allocation9_spill]] %s4193_s24  ;;  %p44_p0 = scmp.ge.s32.totalorder %s43_s4, 2 }
  0x1c   : > { %4902 = sst [smem:[#allocation10_spill]] %s4197_s2  ;;  %s46_s29 = sadd.s32 1, %s4205_s3 }
  0x1d   : > { %4903 = sst [smem:[#allocation11_spill]] %s4201_s25  ;;  %p547_p1 = scmp.ne.s32.totalorder %s4189_s23, %s4185_s22 }
  0x1e   : > { %4904 = sst [smem:[#allocation12_spill]] %s4205_s3  ;;  %p548_p2 = scmp.eq.s32.totalorder %s3471_s27, 3 }
  0x1f   : > { %4905 = sst [smem:[#allocation13_spill]] %s4209_s26  ;;  %s4966_s4 = smov (%p44_p0, %s43_s4), 0 }
  0x20   : > { %4906 = sst [smem:[#allocation14_spill]] %s4966_s4  ;;  %s4968_s29 = smov (!%p44_p0, %s46_s29), %s4205_s3 }
  0x21   : > { %p4372_p3 = por %p548_p2, %p547_p1  ;;  %p553_p4 = scmp.ne.s32.totalorder %s4185_s22, %s4181_s1 }
  0x22   : > { %p48_p5 = scmp.ge.s32.totalorder %s4968_s29, 2  ;;  %p554_p6 = scmp.eq.s32.totalorder %s3472_s28, 3 }
  0x23   : > { %s4907_s30 = scalar_select %p4372_p3, 1, 0 }
  0x24   : > { %p3475_p7 = scmp.ge.s32.totalorder %s4209_s26, 1  ;;  %p724_p8 = scmp.lt.s32.totalorder %s4209_s26, 5 }
  0x25   : > { %4908 = sst [smem:[#allocation15_spill]] %s4907_s30  ;;  %s4970_s29 = smov (%p48_p5, %s4968_s29), 0 }
  0x26   : > { %4909 = sst [smem:[#allocation16_spill]] %s4970_s29  ;;  %p4382_p9 = por %p554_p6, %p553_p4 }
  0x27   : > { %p725_p10 = pnand %p3475_p7, %p724_p8  ;;  %s534_s21 = ssub.s32 %s4205_s3, %s4970_s29 }
  0x28   : > { %s4910_s0 = scalar_select %p4382_p9, 1, 0 }
  0x29   : > { %s537_s27 = sadd.s32 1, %s4189_s23  ;;  %p535_p11 = scmp.eq.s32.totalorder %s534_s21, 0 }
  0x2a   : > { %4911 = sst [smem:[#allocation17_spill]] %s4910_s0  ;;  %728 = sbr.rel (%p725_p10) target bundleno = 5350 (0x14e6), region = 96 }
  0x2b   : > { %s4390_s4 = scalar_select %p535_p11, %s4189_s23, %s537_s27  }
  0x2d   : > { %4912 = sst [smem:[#allocation18_spill]] %s4390_s4 }
  0x31   : > { %s4867_s28 = sand.u32 1, %s4185_s22   ;;  %p852_p12 = scmp.lt.s32.totalorder %s4197_s2, 1 }
  0x32   : > { %s4396_s25 = sshll.u32 %s4867_s28, 3  ;;  %p856_p13 = scmp.lt.s32.totalorder %s4193_s24, 1 }
  0x33   : > { %s853_s0 = scalar_select %p852_p12, %s4197_s2, 1 }
  0x34   : > { %s4401_s1 = scalar_select %p856_p13, %s4193_s24, 1 }
  0x35   : > { %s3477_s21 = sshll.u32 %s853_s0, 3  ;;  %s4913_s3 = sld [smem:[#allocation23_spill]] }
  0x36   : > { %s3600_s23 = sshll.u32 %s4401_s1, 7  ;;  %s4914_s19 = sld [smem:[#allocation24_spill]] }
  0x37   : > { %s3480_s22 = sshll.u32 %s4401_s1, 2  ;;  %s4916_s17 = sld [smem:[#allocation25_spill]] }
  0x38   : > { %s4918_s29 = sld [smem:[#allocation26_spill]]  ;;  %s4919_s15 = sld [smem:[#allocation27_spill]] }
  0x39   : > { %s4921_s5 = sld [smem:[#allocation28_spill]]  ;;  %s4922_s6 = sld [smem:[#allocation29_spill]] }
  0x3a   : > { %s3603_s16 = sshll.u32 %s4401_s1, 5  ;;  %s4923_s7 = sld [smem:[#allocation30_spill]] }
  0x3b   : > { %s855_s4 = scalar_lea.vmem %s4913_s3, %s3477_s21  ;;  %s4927_s11 = sld [smem:[#allocation33_spill]] }
  0x3c   : > { %s4410_s30 = scalar_lea.vmem %s4914_s19, %s3600_s23  ;;  %s3493_s20 = sshll.u32 %s4401_s1, 1 }
  0x3d   : > { %4915 = sst [smem:[#allocation19_spill]] %s4410_s30  ;;  %s4416_s24 = scalar_lea.vmem %s4916_s17, %s3480_s22 }
  0x3e   : > { %4917 = sst [smem:[#allocation20_spill]] %s4416_s24  ;;  %s4421_s3 = scalar_lea.vmem %s4918_s29, %s3600_s23 }
  0x3f   : > { %s4426_s26 = scalar_lea.vmem %s4919_s15, %s3480_s22  ;;  %s4431_s30 = scalar_lea.vmem %s4921_s5, %s3600_s23 }
  0x40   : > { %4920 = sst [smem:[#allocation21_spill]] %s4426_s26  ;;  %s4436_s2 = scalar_lea.vmem %s4922_s6, %s3480_s22 }
  0x41   : > { %s4442_s24 = scalar_lea.vmem %s4923_s7, %s3603_s16  ;;  %s4459_s6 = scalar_lea.vmem %s4927_s11, %s3603_s16 }
  0x42   : > { %4924 = sst [smem:[#allocation22_spill]] %s4442_s24  ;;  %s3605_s24 = sshll.u32 %s4401_s1, 6 }
  0x43   : > { %s4473_s23 = scalar_lea.vmem %s4853_s13, %s3605_s24  ;;  %s4929_s22 = sld [smem:[#allocation35_spill]] }
  0x44   : > { %s4930_s11 = sld [smem:[#allocation36_spill]]  ;;  %s924_s29 = sadd.s32 %s3493_s20, %s853_s0 }
  0x45   : > { %s3494_s7 = sshll.u32 %s924_s29, 3  ;;  %s4931_s21 = sld [smem:[#allocation40_spill]] }
  0x46   : > { %s841_s27 = scalar_lea.vmem [#allocation3], %s4396_s25  ;;  %s4932_s26 = sld [smem:[#allocation9_spill]] }
  0x49   : > { %s915_s18 = scalar_lea.vmem %s4929_s22, %s4401_s1 }
  0x4a   : > { %s918_s10 = scalar_lea.vmem %s4930_s11, %s4401_s1 }
  0x4b   : > { %s4487_s15 = scalar_lea.vmem %s4931_s21, %s3494_s7 }
  0x4c   : > { %p3495_p0 = scmp.ne.s32.totalorder %s4932_s26, 0 }
  0x4d   : > { %v931_v0 = vld [vmem:[%s855_s4] sm:$0xff] (!%p3495_p0)  ;;  %vm932_vm0 = vcmask (!%p3495_p0), 261120  }
  0x4e   : > { %930 = sbr.rel (%p3495_p0) target bundleno = 85 (0x55), region = 100  ;;  %933 = vst.msk [vmem:[#allocation2] sm:$0xff] (!%p3495_p0), %vm932_vm0, %v931_v0 }
  0x55 PF: > { %s4933_s24 = sld [smem:[#allocation19_spill]]  ;;  %v1020_v1 = vld [vmem:[%s4421_s3] sm:$0xff]  ;;  %v1021_v2 = vld [vmem:[%s4421_s3 + $0x8] sm:$0xff]  ;;  %v4211_v4 = vmov 0.0|0.0   ;;  %v1022_v7 = vld [vmem:[%s4421_s3 + $0x10] sm:$0xff]  ;;  %vm4212_vm1 = vmmov 0  }
  0x56   : > { %3932 = vmatprep.subr.bf16.mxu1 %v4211_v4  ;;  %v3933_v5 = vpack.c.bf16 %v1021_v2, %v1020_v1  ;;  %3926 = vmatprep.subr.bf16.mxu0 %v4211_v4  ;;  %v1023_v8 = vld [vmem:[%s4421_s3 + $0x18] sm:$0xff]  ;;  %v4213_v12 = vmov 0.0   ;;  %v1101_v15 = vld [vmem:[%s4431_s30] sm:$0xff]  ;;  %v1102_v16 = vld [vmem:[%s4431_s30 + $0x8] sm:$0xff]  ;;  %vm946_vm2 = vcmask 261120   ;;  %s4934_s7 = sld [smem:[#allocation21_spill]] }
  0x57   : > { %3723 = vmatprep.mubr.msk.f32.mxu1 %vm4212_vm1, %v4213_v12  ;;  %3712 = vmatprep.mubr.msk.f32.mxu0 %vm4212_vm1, %v4213_v12  ;;  %v3936_v13 = vpack.c.bf16 %v1023_v8, %v1022_v7  ;;  %v4509_v17 = vld [vmem:[#allocation2] sm:$0xff]  ;;  %v3939_v18 = vpack.c.bf16 %v1102_v16, %v1101_v15  ;;  %s4935_s9 = sld [smem:[#allocation20_spill]]  ;;  %v1103_v19 = vld [vmem:[%s4431_s30 + $0x10] sm:$0xff]  ;;  %v1104_v20 = vld [vmem:[%s4431_s30 + $0x18] sm:$0xff]  ;;  %vm1182_vm3 = vcmask 64512   ;;  %s4936_s11 = sld [smem:[#allocation22_spill]] }
  0x58   : > { %3934 = vmatpush3.bf16.msra.mxu1 %v3933_v5  ;;  %v3942_v21 = vpack.c.bf16 %v1104_v20, %v1103_v19  ;;  %v3500_v30 = vld [vmem:[%s4436_s2] ss:$0 sm:$0xff]  ;;  %v3513_v51 = vld [vmem:[%s4421_s3 + $0x28] sm:$0xff]  ;;  %v3514_v55 = vld [vmem:[%s4421_s3 + $0x30] sm:$0xff]  ;;  %s4214_s0 = smov 16   ;;  %s4940_s28 = sld [smem:[#allocation32_spill]] }
  0x59   : > { %3935 = vmatprep.subr.bf16.mxu1 %v4211_v4  ;;  %v3512_v50 = vld [vmem:[%s4421_s3 + $0x20] sm:$0xff]  ;;  %v3515_v56 = vld [vmem:[%s4421_s3 + $0x38] sm:$0xff]  ;;  %v3521_v7 = vld [vmem:[%s4431_s30 + $0x30] sm:$0xff]  ;;  %s4942_s29 = sld [smem:[#allocation34_spill]]  ;;  %vm3030_vm4 = vcmask 523264   ;;  %vm1687_vm5 = vcmask 130112  }
  0x5a   : > { %v3951_v53 = vpack.c.bf16 %v3513_v51, %v3512_v50  ;;  %v3954_v57 = vpack.c.bf16 %v3515_v56, %v3514_v55  ;;  %v3519_v5 = vld [vmem:[%s4431_s30 + $0x20] sm:$0xff]  ;;  %vm2250_vm6 = vcmask 195712   ;;  %vm2741_vm7 = vcmask 261312  }
  0x5b   : > { %v935_v3 = vld [vmem:[%s4933_s24] sm:$0xff]  ;;  %v936_v6 = vld [vmem:[%s4933_s24 + $0x8] sm:$0xff]  ;;  %v937_v10 = vld [vmem:[%s4933_s24 + $0x10] sm:$0xff] }
  0x5c   : > { %v3927_v9 = vpack.c.bf16 %v936_v6, %v935_v3  ;;  %v938_v11 = vld [vmem:[%s4933_s24 + $0x18] sm:$0xff]  ;;  %3937 = vmatpush3.bf16.msra.mxu1 %v3936_v13  ;;  %v3498_v22 = vld [vmem:[%s4934_s7] ss:$0 sm:$0xff]  ;;  %v3506_v44 = vld [vmem:[%s4933_s24 + $0x28] sm:$0xff] }
  0x5d   : > { %v3930_v14 = vpack.c.bf16 %v938_v11, %v937_v10  ;;  %3742 = vmatprep.subr.mxu1 %v4213_v12  ;;  %v3496_v23 = vld [vmem:[%s4935_s9] ss:$0 sm:$0xff]  ;;  %v3507_v46 = vld [vmem:[%s4933_s24 + $0x30] sm:$0xff]  ;;  %v3508_v47 = vld [vmem:[%s4933_s24 + $0x38] sm:$0xff] }
  0x5e   : > { %3928 = vmatpush3.bf16.msra.mxu0 %v3927_v9  ;;  %v3505_v43 = vld [vmem:[%s4933_s24 + $0x20] sm:$0xff]  ;;  %v3948_v48 = vpack.c.bf16 %v3508_v47, %v3507_v46  ;;  %v3520_v6 = vld [vmem:[%s4431_s30 + $0x28] sm:$0xff]  ;;  %v3522_v9 = vld [vmem:[%s4431_s30 + $0x38] sm:$0xff]  ;;  %s4941_s16 = scalar_lea.vmem %s4940_s28, %s4401_s1 }
  0x5f   : > { %3929 = vmatprep.subr.bf16.mxu0 %v4211_v4  ;;  %3724 = vmatmul.mubr.msk.f32.vlgmr.msra.gmra.mrb[0].mxu1 %vm946_vm2, %v4509_v17  ;;  %v3945_v45 = vpack.c.bf16 %v3506_v44, %v3505_v43  ;;  %v3517_v62 = vld [vmem:[%s4934_s7 + $0x1] ss:$0 sm:$0xff]  ;;  %v3957_v8 = vpack.c.bf16 %v3520_v6, %v3519_v5  ;;  %v3960_v10 = vpack.c.bf16 %v3522_v9, %v3521_v7  ;;  %v3544_v47 = vld [vmem:[%s4934_s7 + $0x2] ss:$0 sm:$0xff]  ;;  %s4943_s21 = scalar_lea.vmem %s4942_s29, %s4401_s1 }
  0x60   : > { %3744 = vmatprep.mubr.msk.f32.mxu1 %vm4212_vm1, %v4213_v12  ;;  %v3510_v63 = vld [vmem:[%s4935_s9 + $0x1] ss:$0 sm:$0xff] }
  0x62   : > { %3931 = vmatpush3.bf16.msra.mxu0 %v3930_v14 }
  0x63   : > { %3938 = vmatprep.subr.bf16.mxu0 %v4211_v4 }
  0x65   : > { %3713 = vmatmul.mubr.msk.f32.vlgmr.msra.gmra.mrb[0].mxu0 %vm946_vm2, %v4509_v17 }
  0x66   : > { %3940 = vmatpush3.bf16.msra.mxu0 %v3939_v18  ;;  %3734 = vmatprep.mubr.msk.f32.mxu0 %vm4212_vm1, %v4213_v12 }
  0x67   : > { %3941 = vmatprep.subr.bf16.mxu0 %v4211_v4 }
  0x6a   : > { %3943 = vmatpush3.bf16.msra.mxu0 %v3942_v21 }
  0x6b   : > { %3737 = vmatprep.subr.mxu0 %v4213_v12 }
  0x6d   : > { %3735 = vmatmul.mubr.msk.f32.vlgmr.msra.gmra.mrb[2].mxu0 %vm946_vm2, %v4509_v17 }
  0x6e   : > { %3739 = vmatprep.mubr.msk.f32.mxu0 %vm4212_vm1, %v4213_v12 }
 0x132   : > { %v1097_v24 = vpop.f32.mrb[0].mxu1 }
 0x133   : > { %v1098_v25 = vadd.f32 %v3498_v22, %v1097_v24  ;;  %v3725_v26 = vpop.f32.mrb[1].mxu1 }
 0x134   : > { %v3529_v26 = vld [vmem:[%s4936_s11 + $0x8] sm:$0xff] }
 0x135   : > { %3738 = vmatpush3.xpose.msk.msra.mxu0 %vm1182_vm3, %v1098_v25 }
 0x136   : > { %3944 = vmatprep.subr.bf16.mxu0 %v4211_v4 }
 0x138   : > { %v1016_v27 = vpop.f32.mrb[0].mxu0 }
 0x139   : > { %v1017_v28 = vadd.f32 %v3496_v23, %v1016_v27  ;;  %v3714_v29 = vpop.f32.mrb[1].mxu0  ;;  %v3524_v23 = vld [vmem:[%s4436_s2 + $0x1] ss:$0 sm:$0xff] }
 0x13b   : > { %3740 = vmatmul.mubr.msk.f32.vlgmr.msra.gmra.mrb[4].mxu0 %vm1182_vm3, %v1017_v28 }
 0x13c   : > { %3755 = vmatprep.mubr.msk.f32.mxu0 %vm4212_vm1, %v4213_v12  ;;  %3946 = vmatpush3.bf16.msra.mxu0 %v3945_v45 }
 0x13d   : > { %3947 = vmatprep.subr.bf16.mxu0 %v4211_v4 }
 0x140   : > { %v1178_v31 = vpop.f32.mrb[2].mxu0  ;;  %3949 = vmatpush3.bf16.msra.mxu0 %v3948_v48 }
 0x141   : > { %v1179_v32 = vadd.f32 %v3500_v30, %v1178_v31  ;;  %v3736_v33 = vpop.f32.mrb[3].mxu0  ;;  %3956 = vmatprep.subr.bf16.mxu0 %v4211_v4  ;;  %v1345_v30 = vld [vmem:[%s4936_s11] sm:$0xff] }
 0x142   : > { %v3539_v31 = vld [vmem:[%s4421_s3 + $0x40] sm:$0xff] }
 0x143   : > { %3743 = vmatpush3.msra.mxu1 %v1179_v32  ;;  %3756 = vmatmul.mubr.msk.f32.vlgmr.msra.gmra.mrb[6].mxu0 %vm946_vm2, %v4509_v17  ;;  %v3540_v32 = vld [vmem:[%s4421_s3 + $0x48] sm:$0xff] }
 0x144   : > { %3950 = vmatprep.subr.bf16.mxu1 %v4211_v4  ;;  %3777 = vmatprep.mubr.msk.f32.mxu0 %vm4212_vm1, %v4213_v12  ;;  %v3969_v33 = vpack.c.bf16 %v3540_v32, %v3539_v31  ;;  %v3568_v31 = vld [vmem:[%s4421_s3 + $0x78] sm:$0xff] }
 0x145   : > { %3958 = vmatpush3.bf16.msra.mxu0 %v3957_v8 }
 0x146   : > { %3959 = vmatprep.subr.bf16.mxu0 %v4211_v4 }
 0x149   : > { %3961 = vmatpush3.bf16.msra.mxu0 %v3960_v10 }
 0x14a   : > { %3790 = vmatprep.subr.mxu0 %v4213_v12 }
 0x14c   : > { %3778 = vmatmul.mubr.msk.f32.vlgmr.msra.gmra.mrb[8].mxu0 %vm946_vm2, %v4509_v17 }
 0x14d   : > { %3792 = vmatprep.mubr.msk.f32.mxu0 %vm4212_vm1, %v4213_v12  ;;  %3791 = vmatpush3.msra.mxu0 %v3529_v26  ;;  %v3565_v26 = vld [vmem:[%s4421_s3 + $0x60] sm:$0xff] }
 0x14e   : > { %3962 = vmatprep.subr.bf16.mxu0 %v4211_v4 }
 0x20e   : > { %v1255_v34 = vpop.f32.mrb[4].mxu0 }
 0x20f   : > { %v1259_v35 = vmul.f32 0.35355338, %v1255_v34  ;;  %v3741_v36 = vpop.f32.mrb[5].mxu0  ;;  %v3541_v34 = vld [vmem:[%s4421_s3 + $0x50] sm:$0xff] }
 0x211   : > { %v1260_v37 = vsel %vm1182_vm3, %v1259_v35, -inf }
 0x212   : > { %1261 = vmax.xlane.f32.xlu0 %v1260_v37  ;;  %v3532_v37 = vld [vmem:[%s4933_s24 + $0x40] sm:$0xff] }
 0x216   : > { %v1425_v58 = vpop.f32.mrb[6].mxu0 }
 0x217   : > { %v3757_v59 = vpop.f32.mrb[7].mxu0  ;;  %v1426_v3 = vadd.f32 %v3510_v63, %v1425_v58  ;;  %v3546_v58 = vld [vmem:[%s4431_s30 + $0x40] sm:$0xff] }
 0x218   : > { %v3547_v59 = vld [vmem:[%s4431_s30 + $0x48] sm:$0xff] }
 0x21f   : > { %v1591_v22 = vpop.f32.mrb[8].mxu0 }
 0x220   : > { %v3779_v24 = vpop.f32.mrb[9].mxu0  ;;  %v1592_v25 = vadd.f32 %v3524_v23, %v1591_v22  ;;  %v3560_v23 = vld [vmem:[%s4933_s24 + $0x70] sm:$0xff] }
 0x221   : > { %v3561_v24 = vld [vmem:[%s4933_s24 + $0x78] sm:$0xff] }
 0x29f   : > { %v1262_v38 = vpop.xlane.xlu0 %1261 }
 0x2a0   : > { %v1263_v39 = vsub.f32 %v1259_v35, %v1262_v38  ;;  %v3542_v35 = vld [vmem:[%s4421_s3 + $0x58] sm:$0xff]  ;;  %v3533_v38 = vld [vmem:[%s4933_s24 + $0x48] sm:$0xff] }
 0x2a1   : > { %v3972_v36 = vpack.c.bf16 %v3542_v35, %v3541_v34 }
 0x2a2   : > { %v1264_v40 = vmul.f32 1.442695, %v1263_v39  ;;  %v3963_v39 = vpack.c.bf16 %v3533_v38, %v3532_v37 }
 0x2a4   : > { %4093 = vpow2.f32 %v1264_v40  ;;  %v3534_v40 = vld [vmem:[%s4933_s24 + $0x50] sm:$0xff] }
 0x2ae   : > { %v4094_v41 = vpop.eup %4093 }
 0x2af   : > { %v1266_v42 = vsel %vm1182_vm3, %v4094_v41, 0.0 }
 0x2b0   : > { %1267 = vadd.xlane.f32.xlu0 %v1266_v42 }
 0x33d   : > { %v1268_v49 = vpop.xlane.xlu0 %1267 }
 0x33e   : > { %4095 = vrcp.f32 %v1268_v49 }
 0x348   : > { %v4096_v52 = vpop.eup %4095 }
 0x349   : > { %v1270_v54 = vmul.f32 %v4096_v52, %v4094_v41  ;;  %v3535_v41 = vld [vmem:[%s4933_s24 + $0x58] sm:$0xff] }
 0x34a   : > { %v3966_v44 = vpack.c.bf16 %v3535_v41, %v3534_v40  ;;  %v3570_v40 = vld [vmem:[%s4934_s7 + $0x3] ss:$0 sm:$0xff]  ;;  %s4944_s7 = scalar_lea.vmem %s4854_s14, %s4401_s1 }
 0x34b   : > { %1271 = vst.msk [vmem:[%s4487_s15] sm:$0xff] %vm1182_vm3, %v1270_v54  ;;  %3745 = vmatmul.mubr.msk.f32.vlgmr.msra.gmra.mrb[2].mxu1 %vm1182_vm3, %v1270_v54  ;;  %v3537_v54 = vld [vmem:[%s4935_s9 + $0x2] ss:$0 sm:$0xff]  ;;  %v3563_v41 = vld [vmem:[%s4935_s9 + $0x3] ss:$0 sm:$0xff]  ;;  %s4216_s9 = smov 24  }
 0x34c   : > { %3952 = vmatpush3.bf16.msra.mxu1 %v3951_v53  ;;  %3766 = vmatprep.mubr.msk.f32.mxu1 %vm4212_vm1, %v4213_v12 }
 0x34d   : > { %3953 = vmatprep.subr.bf16.mxu1 %v4211_v4 }
 0x350   : > { %3955 = vmatpush3.bf16.msra.mxu1 %v3954_v57 }
 0x351   : > { %3780 = vmatprep.subr.mxu1 %v4213_v12 }
 0x353   : > { %3767 = vmatmul.mubr.msk.f32.vlgmr.msra.gmra.mrb[4].mxu1 %vm946_vm2, %v4509_v17 }
 0x354   : > { %3782 = vmatprep.mubr.msk.f32.mxu1 %vm4212_vm1, %v4213_v12 }
 0x41e   : > { %v1341_v60 = vpop.f32.mrb[2].mxu1 }
 0x41f   : > { %v3746_v61 = vpop.f32.mrb[3].mxu1 }
 0x420   : > { %v3975_v61 = vpack.c.bf16 %v3547_v59, %v3546_v58 }
 0x426   : > { %v1508_v0 = vpop.f32.mrb[4].mxu1 }
 0x427   : > { %v1509_v1 = vadd.f32 %v3517_v62, %v1508_v0  ;;  %v3768_v2 = vpop.f32.mrb[5].mxu1  ;;  %v3549_v62 = vld [vmem:[%s4431_s30 + $0x58] sm:$0xff] }
 0x429   : > { %3781 = vmatpush3.xpose.msk.msra.mxu1 %vm1182_vm3, %v1509_v1 }
 0x42a   : > { %3785 = vmatprep.subr.mxu1 %v4213_v12 }
 0x42c   : > { %3783 = vmatmul.mubr.msk.f32.vlgmr.msra.gmra.mrb[6].mxu1 %vm1182_vm3, %v1426_v3 }
 0x42d   : > { %3787 = vmatprep.mubr.msk.f32.mxu1 %vm4212_vm1, %v4213_v12  ;;  %3786 = vmatpush3.msra.mxu1 %v1592_v25  ;;  %v3984_v25 = vpack.c.bf16 %v3561_v24, %v3560_v23  ;;  %v2932_v24 = vld [vmem:[%s4459_s6 + $0x10] sm:$0xff] }
 0x42e   : > { %3795 = vmatprep.subr.mxu1 %v4213_v12 }
 0x4ff   : > { %v1667_v11 = vpop.f32.mrb[6].mxu1 }
 0x500   : > { %v1671_v13 = vmul.f32 0.35355338, %v1667_v11  ;;  %v3784_v14 = vpop.f32.mrb[7].mxu1  ;;  %v3551_v11 = vld [vmem:[%s4436_s2 + $0x2] ss:$0 sm:$0xff] }
 0x502   : > { %v1672_v15 = vsel %vm1182_vm3, %v1671_v13, -inf }
 0x503   : > { %1673 = vmax.xlane.f32.xlu1 %v1672_v15  ;;  %v3556_v15 = vld [vmem:[%s4936_s11 + $0x10] sm:$0xff] }
 0x590   : > { %v1674_v16 = vpop.xlane.xlu1 %1673 }
 0x591   : > { %v1675_v18 = vsub.f32 %v1671_v13, %v1674_v16 }
 0x593   : > { %v1676_v19 = vmul.f32 1.442695, %v1675_v18 }
 0x595   : > { %4097 = vpow2.f32 %v1676_v19 }
 0x59f   : > { %v4098_v20 = vpop.eup %4097 }
 0x5a0   : > { %v1678_v21 = vsel %vm1182_vm3, %v4098_v20, 0.0 }
 0x5a1   : > { %1679 = vadd.xlane.f32.xlu1 %v1678_v21  ;;  %v3559_v21 = vld [vmem:[%s4933_s24 + $0x68] sm:$0xff] }
 0x62e   : > { %v1680_v27 = vpop.xlane.xlu1 %1679 }
 0x62f   : > { %4099 = vrcp.f32 %v1680_v27  ;;  %v3566_v27 = vld [vmem:[%s4421_s3 + $0x68] sm:$0xff] }
 0x639   : > { %v4100_v28 = vpop.eup %4099 }
 0x63a   : > { %v4588_v29 = vmul.f32 %v4100_v28, %v4098_v20  ;;  %v3558_v20 = vld [vmem:[%s4933_s24 + $0x60] sm:$0xff]  ;;  %v3987_v28 = vpack.c.bf16 %v3566_v27, %v3565_v26 }
 0x63b   : > { %v3981_v22 = vpack.c.bf16 %v3559_v21, %v3558_v20  ;;  %v3015_v27 = vld [vmem:[%s4473_s23] sm:$0xff] }
 0x63c   : > { %3788 = vmatmul.mubr.msk.f32.vlgmr.msra.gmra.mrb[8].mxu1 %vm1182_vm3, %v4588_v29 }
 0x63d   : > { %3796 = vmatpush3.msra.mxu1 %v1345_v30  ;;  %3797 = vmatprep.mubr.msk.f32.mxu1 %vm4212_vm1, %v4213_v12  ;;  %v3567_v30 = vld [vmem:[%s4421_s3 + $0x70] sm:$0xff]  ;;  %s4947_s3 = sld [smem:[#allocation9_spill]] }
 0x63e   : > { %3968 = vmatprep.subr.bf16.mxu1 %v4211_v4  ;;  %v3990_v34 = vpack.c.bf16 %v3568_v31, %v3567_v30  ;;  %v3017_v30 = vld [vmem:[%s4473_s23 + $0x10] sm:$0xff] }
 0x640   : > { %3798 = vmatmul.mubr.msk.f32.vlgmr.msra.gmra.mrb[10].mxu1 %vm1182_vm3, %v1341_v60  ;;  %v3548_v60 = vld [vmem:[%s4431_s30 + $0x50] sm:$0xff] }
 0x641   : > { %3970 = vmatpush3.bf16.msra.mxu1 %v3969_v33  ;;  %3819 = vmatprep.mubr.msk.f32.mxu1 %vm4212_vm1, %v4213_v12  ;;  %v3978_v63 = vpack.c.bf16 %v3549_v62, %v3548_v60  ;;  %v3577_v62 = vld [vmem:[%s4436_s2 + $0x3] ss:$0 sm:$0xff]  ;;  %s4938_s2 = sld [smem:[#allocation31_spill]] }
 0x642   : > { %3971 = vmatprep.subr.bf16.mxu1 %v4211_v4 }
 0x643   : > { %p3593_p1 = scmp.ne.s32.totalorder %s4947_s3, 1 }
 0x645   : > { %3973 = vmatpush3.bf16.msra.mxu1 %v3972_v36 }
 0x646   : > { %3833 = vmatprep.subr.mxu1 %v4213_v12 }
 0x647   : > { %s4939_s22 = scalar_lea.vmem %s4938_s2, %s4401_s1 }
 0x648   : > { %3820 = vmatmul.mubr.msk.f32.vlgmr.msra.gmra.mrb[12].mxu1 %vm946_vm2, %v4509_v17 }
 0x649   : > { %3835 = vmatprep.mubr.msk.f32.mxu1 %vm4212_vm1, %v4213_v12 }
 0x70f   : > { %v1757_v42 = vpop.f32.mrb[8].mxu1 }
 0x710   : > { %v3789_v43 = vpop.f32.mrb[9].mxu1  ;;  %3793 = vmatmul.mubr.msk.f32.vlgmr.msra.gmra.mrb[10].mxu0 %vm1182_vm3, %v1757_v42 }
 0x711   : > { %3964 = vmatpush3.bf16.msra.mxu0 %v3963_v39  ;;  %3808 = vmatprep.mubr.msk.f32.mxu0 %vm4212_vm1, %v4213_v12 }
 0x712   : > { %3965 = vmatprep.subr.bf16.mxu0 %v4211_v4 }
 0x713   : > { %v1905_v45 = vpop.f32.mrb[10].mxu1 }
 0x714   : > { %v3799_v46 = vpop.f32.mrb[11].mxu1 }
 0x715   : > { %3967 = vmatpush3.bf16.msra.mxu0 %v3966_v44  ;;  %v3572_v46 = vld [vmem:[%s4431_s30 + $0x60] sm:$0xff] }
 0x716   : > { %3974 = vmatprep.subr.bf16.mxu0 %v4211_v4 }
 0x718   : > { %3809 = vmatmul.mubr.msk.f32.vlgmr.msra.gmra.mrb[12].mxu0 %vm946_vm2, %v4509_v17 }
 0x719   : > { %3830 = vmatprep.mubr.msk.f32.mxu0 %vm4212_vm1, %v4213_v12  ;;  %3976 = vmatpush3.bf16.msra.mxu0 %v3975_v61 }
 0x71a   : > { %3977 = vmatprep.subr.bf16.mxu0 %v4211_v4 }
 0x71b   : > { %v2071_v48 = vpop.f32.mrb[12].mxu1 }
 0x71c   : > { %v2072_v49 = vadd.f32 %v3544_v47, %v2071_v48  ;;  %v3821_v50 = vpop.f32.mrb[13].mxu1  ;;  %v3573_v47 = vld [vmem:[%s4431_s30 + $0x68] sm:$0xff]  ;;  %v3574_v48 = vld [vmem:[%s4431_s30 + $0x70] sm:$0xff] }
 0x71d   : > { %3979 = vmatpush3.bf16.msra.mxu0 %v3978_v63  ;;  %v3575_v50 = vld [vmem:[%s4431_s30 + $0x78] sm:$0xff]  ;;  %s4937_s30 = scalar_lea.vmem %s4848_s8, %s4401_s1 }
 0x71e   : > { %3834 = vmatpush3.xpose.msk.msra.mxu1 %vm1182_vm3, %v2072_v49  ;;  %3843 = vmatprep.subr.mxu0 %v4213_v12  ;;  %v3993_v49 = vpack.c.bf16 %v3573_v47, %v3572_v46  ;;  %v3587_v47 = vld [vmem:[%s4943_s21] ss:$0 sm:$0xff] }
 0x71f   : > { %3838 = vmatprep.subr.mxu1 %v4213_v12 }
 0x720   : > { %3831 = vmatmul.mubr.msk.f32.vlgmr.msra.gmra.mrb[14].mxu0 %vm946_vm2, %v4509_v17 }
 0x721   : > { %3845 = vmatprep.mubr.msk.f32.mxu0 %vm4212_vm1, %v4213_v12  ;;  %3844 = vmatpush3.msra.mxu0 %v3556_v15 }
 0x722   : > { %3986 = vmatprep.subr.bf16.mxu0 %v4211_v4 }
 0x7e3   : > { %v1832_v51 = vpop.f32.mrb[10].mxu0 }
 0x7e4   : > { %v4625_v52 = vadd.f32 %v1905_v45, %v1832_v51  ;;  %v3794_v53 = vpop.f32.mrb[11].mxu0  ;;  %v3996_v51 = vpack.c.bf16 %v3575_v50, %v3574_v48 }
 0x7eb   : > { %v1988_v55 = vpop.f32.mrb[12].mxu0 }
 0x7ec   : > { %v1989_v56 = vadd.f32 %v3537_v54, %v1988_v55  ;;  %v3810_v57 = vpop.f32.mrb[13].mxu0 }
 0x7ee   : > { %3836 = vmatmul.mubr.msk.f32.vlgmr.msra.gmra.mrb[14].mxu1 %vm1182_vm3, %v1989_v56 }
 0x7ef   : > { %3840 = vmatprep.mubr.msk.f32.mxu1 %vm4212_vm1, %v4213_v12 }
 0x7f3   : > { %v2154_v10 = vpop.f32.mrb[14].mxu0 }
 0x7f4   : > { %v3832_v13 = vpop.f32.mrb[15].mxu0  ;;  %v2155_v14 = vadd.f32 %v3551_v11, %v2154_v10 }
 0x7f6   : > { %3839 = vmatpush3.msra.mxu1 %v2155_v14 }
 0x7f7   : > { %3980 = vmatprep.subr.bf16.mxu1 %v4211_v4 }
 0x8c1   : > { %v2230_v0 = vpop.f32.mrb[14].mxu1 }
 0x8c2   : > { %v2234_v1 = vmul.f32 0.35355338, %v2230_v0  ;;  %v3837_v2 = vpop.f32.mrb[15].mxu1 }
 0x8c4   : > { %v2235_v3 = vsel %vm1182_vm3, %v2234_v1, -inf }
 0x8c5   : > { %2236 = vmax.xlane.f32.xlu0 %v2235_v3 }
 0x952   : > { %v2237_v5 = vpop.xlane.xlu0 %2236 }
 0x953   : > { %v2238_v6 = vsub.f32 %v2234_v1, %v2237_v5  ;;  %v3582_v1 = vld [vmem:[%s4936_s11 + $0x18] sm:$0xff] }
 0x955   : > { %v2239_v7 = vmul.f32 1.442695, %v2238_v6 }
 0x957   : > { %4101 = vpow2.f32 %v2239_v7 }
 0x961   : > { %v4102_v8 = vpop.eup %4101 }
 0x962   : > { %v2241_v9 = vsel %vm1182_vm3, %v4102_v8, 0.0 }
 0x963   : > { %2242 = vadd.xlane.f32.xlu1 %v2241_v9  ;;  %v3584_v9 = vld [vmem:[%s4937_s30] ss:$0 sm:$0xff] }
 0x9f0   : > { %v2243_v16 = vpop.xlane.xlu1 %2242 }
 0x9f1   : > { %4103 = vrcp.f32 %v2243_v16 }
 0x9fb   : > { %v4104_v18 = vpop.eup %4103 }
 0x9fc   : > { %v4647_v19 = vmul.f32 %v4104_v18, %v4102_v8 }
 0x9fe   : > { %3841 = vmatmul.mubr.msk.f32.vlgmr.msra.gmra.mrb[16].mxu1 %vm1182_vm3, %v4647_v19 }
 0x9ff   : > { %3856 = vmatprep.mubr.msk.f32.mxu1 %vm4212_vm1, %v4213_v12  ;;  %3982 = vmatpush3.bf16.msra.mxu1 %v3981_v22  ;;  %v2931_v22 = vld [vmem:[%s4459_s6 + $0x8] sm:$0xff] }
 0xa00   : > { %3983 = vmatprep.subr.bf16.mxu1 %v4211_v4 }
 0xa03   : > { %3985 = vmatpush3.bf16.msra.mxu1 %v3984_v25  ;;  %v2933_v25 = vld [vmem:[%s4459_s6 + $0x18] sm:$0xff] }
 0xa04   : > { %3992 = vmatprep.subr.bf16.mxu1 %v4211_v4  ;;  %v4002_v26 = vpack.c.bf16 %v2933_v25, %v2932_v24 }
 0xa06   : > { %3857 = vmatmul.mubr.msk.f32.vlgmr.msra.gmra.mrb[18].mxu1 %vm946_vm2, %v4509_v17 }
 0xa07   : > { %3878 = vmatprep.mubr.msk.f32.mxu1 %vm4212_vm1, %v4213_v12  ;;  %3994 = vmatpush3.bf16.msra.mxu1 %v3993_v49 }
 0xa08   : > { %3995 = vmatprep.subr.bf16.mxu1 %v4211_v4 }
 0xa0b   : > { %3997 = vmatpush3.bf16.msra.mxu1 %v3996_v51 }
 0xa0c   : > { %3891 = vmatprep.subr.mxu1 %v4213_v12 }
 0xa0e   : > { %3879 = vmatmul.mubr.msk.f32.vlgmr.msra.gmra.mrb[20].mxu1 %vm946_vm2, %v4509_v17 }
 0xa0f   : > { %3893 = vmatprep.mubr.msk.f32.mxu1 %vm4212_vm1, %v4213_v12  ;;  %3892 = vmatpush3.msra.mxu1 %v3582_v1 }
 0xa10   : > { %4004 = vmatprep.subr.bf16.mxu1 %v4211_v4 }
 0xad1   : > { %v2320_v32 = vpop.f32.mrb[16].mxu1 }
 0xad2   : > { %v3842_v33 = vpop.f32.mrb[17].mxu1  ;;  %3846 = vmatmul.mubr.msk.f32.vlgmr.msra.gmra.mrb[16].mxu0 %vm1182_vm3, %v2320_v32  ;;  %v3018_v32 = vld [vmem:[%s4473_s23 + $0x18] sm:$0xff] }
 0xad3   : > { %3988 = vmatpush3.bf16.msra.mxu0 %v3987_v28  ;;  %3867 = vmatprep.mubr.msk.f32.mxu0 %vm4212_vm1, %v4213_v12  ;;  %v3016_v28 = vld [vmem:[%s4473_s23 + $0x8] sm:$0xff]  ;;  %v3019_v33 = vld [vmem:[%s4473_s23 + $0x20] sm:$0xff] }
 0xad4   : > { %3989 = vmatprep.subr.bf16.mxu0 %v4211_v4  ;;  %v4005_v31 = vpack.c.bf16 %v3016_v28, %v3015_v27 }
 0xad7   : > { %3991 = vmatpush3.bf16.msra.mxu0 %v3990_v34  ;;  %v3020_v34 = vld [vmem:[%s4473_s23 + $0x28] sm:$0xff] }
 0xad8   : > { %3881 = vmatprep.subr.mxu0 %v4213_v12 }
 0xad9   : > { %v2479_v35 = vpop.f32.mrb[18].mxu1 }
 0xada   : > { %3868 = vmatmul.mubr.msk.f32.vlgmr.msra.gmra.mrb[18].mxu0 %vm946_vm2, %v4509_v17  ;;  %v3858_v36 = vpop.f32.mrb[19].mxu1  ;;  %v2480_v45 = vadd.f32 %v3563_v41, %v2479_v35  ;;  %v4011_v35 = vpack.c.bf16 %v3020_v34, %v3019_v33 }
 0xadb   : > { %3883 = vmatprep.mubr.msk.f32.mxu0 %vm4212_vm1, %v4213_v12 }
 0xae1   : > { %v2645_v61 = vpop.f32.mrb[20].mxu1 }
 0xae2   : > { %v3880_v63 = vpop.f32.mrb[21].mxu1  ;;  %v2646_v0 = vadd.f32 %v3577_v62, %v2645_v61 }
 0xba5   : > { %v2395_v37 = vpop.f32.mrb[16].mxu0 }
 0xba6   : > { %v2399_v38 = vadd.f32 %v2395_v37, %v4625_v52  ;;  %v3847_v39 = vpop.f32.mrb[17].mxu0 }
 0xbad   : > { %v2562_v42 = vpop.f32.mrb[18].mxu0 }
 0xbae   : > { %v2563_v43 = vadd.f32 %v3570_v40, %v2562_v42  ;;  %v3869_v44 = vpop.f32.mrb[19].mxu0  ;;  %v3585_v40 = vld [vmem:[%s4939_s22] ss:$0 sm:$0xff]  ;;  %s4949_s22 = sld [smem:[#allocation38_spill]] (!%p3593_p1) }
 0xbaf   : > { %v3586_v42 = vld [vmem:[%s4941_s16] ss:$0 sm:$0xff]  ;;  %v3021_v44 = vld [vmem:[%s4473_s23 + $0x30] sm:$0xff] }
 0xbb0   : > { %3882 = vmatpush3.xpose.msk.msra.mxu0 %vm1182_vm3, %v2563_v43 }
 0xbb1   : > { %3886 = vmatprep.subr.mxu0 %v4213_v12 }
 0xbb3   : > { %3884 = vmatmul.mubr.msk.f32.vlgmr.msra.gmra.mrb[20].mxu0 %vm1182_vm3, %v2480_v45  ;;  %v3022_v45 = vld [vmem:[%s4473_s23 + $0x38] sm:$0xff]  ;;  %s4215_s23 = smov 8  }
 0xbb4   : > { %3888 = vmatprep.mubr.msk.f32.mxu0 %vm4212_vm1, %v4213_v12  ;;  %3887 = vmatpush3.msra.mxu0 %v2646_v0  ;;  %v4014_v46 = vpack.c.bf16 %v3022_v45, %v3021_v44  ;;  %v3595_v24 = vld [vmem:[%s4949_s22] ss:$0 sm:$0xff] (!%p3593_p1) }
 0xbb5   : > { %3998 = vmatprep.subr.bf16.mxu0 %v4211_v4 }
 0xc86   : > { %v2721_v52 = vpop.f32.mrb[20].mxu0 }
 0xc87   : > { %v2725_v53 = vmul.f32 0.35355338, %v2721_v52  ;;  %v3885_v54 = vpop.f32.mrb[21].mxu0  ;;  %v3589_v52 = vld [vmem:[%s4944_s7] ss:$0 sm:$0xff] }
 0xc89   : > { %v2726_v55 = vsel %vm1182_vm3, %v2725_v53, -inf }
 0xc8a   : > { %2727 = vmax.xlane.f32.xlu0 %v2726_v55 }
 0xd17   : > { %v2728_v56 = vpop.xlane.xlu0 %2727 }
 0xd18   : > { %v2729_v57 = vsub.f32 %v2725_v53, %v2728_v56 }
 0xd1a   : > { %v2730_v58 = vmul.f32 1.442695, %v2729_v57 }
 0xd1c   : > { %4105 = vpow2.f32 %v2730_v58 }
 0xd26   : > { %v4106_v59 = vpop.eup %4105 }
 0xd27   : > { %v2732_v60 = vsel %vm1182_vm3, %v4106_v59, 0.0 }
 0xd28   : > { %2733 = vadd.xlane.f32.xlu1 %v2732_v60 }
 0xdb5   : > { %v2734_v2 = vpop.xlane.xlu1 %2733 }
 0xdb6   : > { %4107 = vrcp.f32 %v2734_v2 }
 0xdc0   : > { %v4108_v3 = vpop.eup %4107 }
 0xdc1   : > { %v4700_v5 = vmul.f32 %v4108_v3, %v4106_v59 }
 0xdc3   : > { %3889 = vmatmul.mubr.msk.f32.vlgmr.msra.gmra.mrb[22].mxu0 %vm1182_vm3, %v4700_v5 }
 0xdc4   : > { %3904 = vmatprep.mubr.msk.f32.mxu0 %vm4212_vm1, %v4213_v12 }
 0xe96   : > { %v2811_v6 = vpop.f32.mrb[22].mxu0 }
 0xe97   : > { %v3890_v7 = vpop.f32.mrb[23].mxu0  ;;  %3894 = vmatmul.mubr.msk.f32.vlgmr.msra.gmra.mrb[22].mxu1 %vm1182_vm3, %v2811_v6 }
 0xe98   : > { %3923 = vmatprep.mubr.msk.f32.mxu1 %vm4212_vm1, %v4213_v12  ;;  %4006 = vmatpush3.bf16.msra.mxu1 %v4005_v31  ;;  %v3591_v7 = vld [vmem:[%s915_s18] ss:$0 sm:$0xff]  ;;  %s4948_s18 = sld [smem:[#allocation37_spill]] (!%p3593_p1) }
 0xe99   : > { %4007 = vmatprep.subr.bf16.mxu1 %v4211_v4 }
 0xf6a   : > { %v2886_v8 = vpop.f32.mrb[22].mxu1 }
 0xf6b   : > { %v2890_v10 = vadd.f32 %v2886_v8, %v2399_v38  ;;  %v3895_v11 = vpop.f32.mrb[23].mxu1 }
 0xf6d   : > { %v2898_v13 = vadd.f32 %v3584_v9, %v2890_v10  ;;  %v3592_v9 = vld [vmem:[%s918_s10] ss:$0 sm:$0xff] }
 0xf6f   : > { %v2899_v14 = vadd.f32 %v2898_v13, %v4509_v17  ;;  %v2930_v17 = vld [vmem:[%s4459_s6] sm:$0xff] }
 0xf70   : > { %v3999_v23 = vpack.c.bf16 %v2931_v22, %v2930_v17  ;;  %v3594_v22 = vld [vmem:[%s4948_s18] ss:$0 sm:$0xff] (!%p3593_p1) }
 0xf71   : > { %v2902_v15 = vsel %vm946_vm2, %v2899_v14, 0.0 }
 0xf72   : > { %2903 = vadd.xlane.f32.xlu0 %v2902_v15  ;;  %4000 = vmatpush3.bf16.msra.mxu0 %v3999_v23 }
 0xf73   : > { %4001 = vmatprep.subr.bf16.mxu0 %v4211_v4 }
 0xf76   : > { %4003 = vmatpush3.bf16.msra.mxu0 %v4002_v26 }
 0xfff   : > { %v2904_v16 = vpop.xlane.xlu0 %2903 }
0x1000   : > { %v2906_v12 = vmul.f32 0.03125, %v2904_v16 }
0x1002   : > { %v2907_v18 = vsub.f32 %v2899_v14, %v2906_v12 }
0x1004   : > { %v2908_v20 = vmul.f32 %v2907_v18, %v2907_v18 }
0x1006   : > { %v2909_v21 = vsel %vm946_vm2, %v2908_v20, 0.0 }
0x1007   : > { %2910 = vadd.xlane.f32.xlu1 %v2909_v21 }
0x1018   : > { %2247 = vrot.lane.b32.xlu1 %v4647_v19, %s4214_s0  ;;  %v4008_v19 = vpack.c.bf16 %v3018_v32, %v3017_v30 }
0x101a   : > { %4009 = vmatpush3.bf16.msra.mxu1 %v4008_v19 }
0x101b   : > { %4010 = vmatprep.subr.bf16.mxu1 %v4211_v4 }
0x101e   : > { %4012 = vmatpush3.bf16.msra.mxu1 %v4011_v35 }
0x101f   : > { %4013 = vmatprep.subr.bf16.mxu1 %v4211_v4 }
0x1022   : > { %4015 = vmatpush3.bf16.msra.mxu1 %v4014_v46 }
0x1094   : > { %v2911_v36 = vpop.xlane.xlu1 %2910 }
0x1095   : > { %v2912_v37 = vmul.f32 0.03125, %v2911_v36 }
0x1097   : > { %v2913_v38 = vadd.f32 1e-05, %v2912_v37 }
0x1098   : > { %v2248_v62 = vpop.permute.xlu1 %2247 }
0x1099   : > { %4109 = vrsqrt.f32 %v2913_v38 }
0x10a3   : > { %v4110_v39 = vpop.eup %4109 }
0x10a4   : > { %v2915_v41 = vmul.f32 %v4110_v39, %v2907_v18 }
0x10a6   : > { %v2922_v43 = vmul.f32 %v3585_v40, %v2915_v41 }
0x10a8   : > { %v2929_v4 = vadd.f32 %v3586_v42, %v2922_v43 }
0x10aa   : > { %3905 = vmatmul.mubr.msk.f32.vlgmr.msra.gmra.mrb[24].mxu0 %vm946_vm2, %v2929_v4 }
0x117d   : > { %v3010_v48 = vpop.f32.mrb[24].mxu0 }
0x117e   : > { %v3011_v49 = vadd.f32 %v3587_v47, %v3010_v48  ;;  %v3906_v50 = vpop.f32.mrb[25].mxu0 }
0x1180   : > { %v3014_v51 = vmax.f32 %v3011_v49, 0.0 }
0x1182   : > { %3924 = vmatmul.mubr.msk.f32.vlgmr.msra.gmra.mrb[24].mxu1 %vm3030_vm4, %v3014_v51 }
0x1255   : > { %v3100_v53 = vpop.f32.mrb[24].mxu1 }
0x1256   : > { %v3101_v54 = vadd.f32 %v3589_v52, %v3100_v53  ;;  %v3925_v55 = vpop.f32.mrb[25].mxu1 }
0x1258   : > { %v3104_v56 = vadd.f32 %v3101_v54, %v2929_v4 }
0x125a   : > { %v3107_v57 = vsel %vm946_vm2, %v3104_v56, 0.0 }
0x125b   : > { %3108 = vadd.xlane.f32.xlu0 %v3107_v57 }
0x1271   : > { %1684 = vrot.lane.b32.xlu0 %v4588_v29, %s4215_s23 }
0x12e8   : > { %v3109_v58 = vpop.xlane.xlu0 %3108 }
0x12e9   : > { %v3110_v59 = vmul.f32 0.03125, %v3109_v58 }
0x12eb   : > { %v3111_v60 = vsub.f32 %v3104_v56, %v3110_v59 }
0x12ec   : > { %v1685_v61 = vpop.permute.xlu0 %1684 }
0x12ed   : > { %1688 = vst.msk [vmem:[%s4487_s15] sm:$0xff] %vm1687_vm5, %v1685_v61  ;;  %v3112_v63 = vmul.f32 %v3111_v60, %v3111_v60 }
0x12ee   : > { %2251 = vst.msk [vmem:[%s4487_s15] sm:$0xff] %vm2250_vm6, %v2248_v62 }
0x12ef   : > { %v3113_v0 = vsel %vm946_vm2, %v3112_v63, 0.0 }
0x12f0   : > { %3114 = vadd.xlane.f32.xlu1 %v3113_v0 }
0x1301   : > { %2738 = vrot.lane.b32.xlu1 %v4700_v5, %s4216_s9 }
0x137d   : > { %v3115_v29 = vpop.xlane.xlu1 %3114 }
0x137e   : > { %v3116_v1 = vmul.f32 0.03125, %v3115_v29 }
0x1380   : > { %v3117_v2 = vadd.f32 1e-05, %v3116_v1 }
0x1381   : > { %v2739_v3 = vpop.permute.xlu1 %2738 }
0x1382   : > { %4111 = vrsqrt.f32 %v3117_v2  ;;  %2742 = vst.msk [vmem:[%s4487_s15] sm:$0xff] %vm2741_vm7, %v2739_v3 }
0x138c   : > { %v4112_v6 = vpop.eup %4111 }
0x138d   : > { %v3119_v8 = vmul.f32 %v4112_v6, %v3111_v60  ;;  %3138 = sbr.rel (%p3593_p1) target bundleno = 5325 (0x14cd), region = 104 }
0x138f   : > { %v3126_v5 = vmul.f32 %v3591_v7, %v3119_v8 }
0x1391   : > { %v3133_v10 = vadd.f32 %v3592_v9, %v3126_v5 }
0x1393   : > { %3134 = vst.msk [vmem:[#allocation2] sm:$0xff] %vm946_vm2, %v3133_v10  ;;  %v3141_v11 = vsel (!%p3593_p1), %vm946_vm2, %v3133_v10, 0.0 }
0x1394   : > { %3142 = vadd.xlane.f32.xlu0 %v3141_v11 }
0x1421   : > { %v3143_v13 = vpop.xlane.xlu0 %3142 }
0x1422   : > { %v3144_v14 = vmul.f32 0.03125, %v3143_v13 }
0x1424   : > { %v3145_v15 = vsub.f32 %v3133_v10, %v3144_v14 }
0x1426   : > { %v3146_v16 = vmul.f32 %v3145_v15, %v3145_v15 }
0x1428   : > { %v3147_v12 = vsel %vm946_vm2, %v3146_v16, 0.0 }
0x1429   : > { %3148 = vadd.xlane.f32.xlu0 %v3147_v12 }
0x14b6   : > { %v3149_v18 = vpop.xlane.xlu0 %3148 }
0x14b7   : > { %v3150_v20 = vmul.f32 0.03125, %v3149_v18 }
0x14b9   : > { %v3151_v21 = vadd.f32 1e-05, %v3150_v20 }
0x14bb   : > { %4113 = vrsqrt.f32 %v3151_v21 }
0x14c5   : > { %v4114_v17 = vpop.eup %4113 }
0x14c6   : > { %v3153_v23 = vmul.f32 %v4114_v17, %v3145_v15 }
0x14c8   : > { %v3160_v25 = vmul.f32 %v3594_v22, %v3153_v23 }
0x14ca   : > { %v3167_v26 = vadd.f32 %v3595_v24, %v3160_v25 }
0x14cc   : > { %3168 = vst.msk [vmem:[%s841_s27] sm:$0xff] %vm946_vm2, %v3167_v26 }
0x14cd PF: > { %s4950_s19 = sld [smem:[#allocation10_spill]]  ;;  %s4951_s5 = sld [smem:[#allocation7_spill]] }
0x14ce   : > { %s4953_s29 = sld [smem:[#allocation39_spill]]  ;;  %s3191_s26 = sshll.u32 %s841_s27, 4  ;;  %s3192_s26 = int_to_ptr.vmem [resolvable:$true] %s3191_s26 }
0x14cf   : > { %s4115_s23 = scalar_lea.vmem %s3192_s26, 128  ;;  %s4217_s9 = smov [#allocation3]  }
0x14d0   : > { %p4116_p2 = scmp.ne.s32.totalorder %s3192_s26, %s4115_s23  ;;  %s4119_s11 = sshll.u32 %s4217_s9, 4  ;;  %s4120_s11 = int_to_ptr.vmem [resolvable:$false] %s4119_s11 }
0x14d1   : > { %s4121_s12 = scalar_lea.vmem %s4120_s11, 256  ;;  %p4122_p6 = scmp.lt.s32.totalorder %s3192_s26, %s4120_s11 }
0x14d2   : > { %p4117_p4 = pnand %p4116_p2, %p4372_p3  ;;  %p4123_p7 = scmp.lt.s32.totalorder %s4121_s12, %s4115_s23 }
0x14d3   : > { %s3597_s16 = sshll.u32 %s4950_s19, 7  ;;  %s4954_s24 = sand.u32 1, %s4951_s5  }
0x14d4   : > { %s4789_s21 = scalar_lea.hbm %s4953_s29, %s3597_s16  ;;  %s3170_s7 = scalar_lea.sflag [#allocation4], %s4954_s24 }
0x14d5   : > { %p4118_p5 = pneg %p4117_p4  ;;  %p4124_p8 = por %p4123_p7, %p4122_p6 }
0x14d7   : > { %p4125_p10 = pnand %p4124_p8, %p4118_p5 }
0x14d9   : > { %4128 = shalt.err (!%p4125_p10)
}
0x14da   : > { %s4129_s25 = scalar_lea.hbm %s4789_s21, 128  ;;  %s4133_s30 = scalar_lea.hbm %s4953_s29, 256 }
0x14db   : > { %p4130_p11 = scmp.ne.s32.totalorder %s4789_s21, %s4129_s25  ;;  %p4134_p0 = scmp.lt.u32.totalorder %s4789_s21, %s4953_s29 }
0x14dc   : > { %p4135_p1 = scmp.lt.u32.totalorder %s4133_s30, %s4129_s25  ;;  %p4137_p4 = scmp.lt.u32.totalorder %s4129_s25, %s4789_s21 }
0x14dd   : > { %p4131_p12 = pnand %p4130_p11, %p4372_p3 }
0x14de   : > { %p4136_p2 = por %p4135_p1, %p4134_p0 }
0x14df   : > { %p4132_p13 = pneg %p4131_p12 }
0x14e0   : > { %p4138_p5 = por %p4137_p4, %p4136_p2 }
0x14e2   : > { %p4139_p6 = pnand %p4138_p5, %p4132_p13 }
0x14e4   : > { %4142 = shalt.err (!%p4139_p6)
}
0x14e5   : > { %4016 = dma.vmem_to_hbm [thread:$0]  (%p4372_p3), %s3192_s26, 128, %s4789_s21, %s3170_s7  }
0x14e6 PF: > { %s4955_s3 = sld [smem:[#allocation13_spill]]  ;;  %s4956_s10 = sld [smem:[#allocation6_spill]] }
0x14ec   : > { %p4022_p7 = scmp.ge.s32.totalorder %s4955_s3, 2  ;;  %s3206_s18 = sand.u32 1, %s4956_s10  }
0x14ed   : > { %s3207_s15 = scalar_lea.sflag [#allocation4], %s3206_s18 }
0x14ee   : > { %p4019_p8 = pnand %p4022_p7, %p4382_p9 }
0x14f0   : > { %4176 = dma.done.wait (!%p4019_p8), %s3207_s15, 128  }
0x14f1   : > { %4178 = vsyncadd (!%p4019_p8), %s3207_s15, 4294967168  ;;  %s34_s26 = sadd.s32 1, %s4955_s3   ;;  %s4958_s1 = sld [smem:[#allocation7_spill]] }
0x14f2   : > { %p31_p10 = scmp.ge.s32.totalorder %s34_s26, 6   ;;  %s4959_s22 = sld [smem:[#allocation8_spill]] }
0x14f3   : > { %s4960_s23 = sld [smem:[#allocation18_spill]]  ;;  %s4961_s24 = sld [smem:[#allocation11_spill]] }
0x14f4   : > { %s4962_s2 = sld [smem:[#allocation12_spill]]  ;;  %s4963_s25 = sld [smem:[#allocation14_spill]] }
0x14f5   : > { %s4964_s3 = sld [smem:[#allocation16_spill]]  ;;  %33 = sbr.rel (!%p31_p10) target bundleno = 24 (0x18), region = 220 }
0x14fc   :  { %3223 = vsyncpa [#allocation4], 1 }
0x14fd   :  { %3225 = vsyncpa [#allocation4 + $0x1], 1 }

</bundles_post_ra>
